<compile_context>
chip_gen: v7x
topology: tpu7x:2x2x1
jax: 0.10.0
libtpu: 0.0.40
codegen_flags: <defaults>
</compile_context>

<pallas_src>
import jax
import jax.numpy as jnp
from jax.experimental import pallas as pl
from jax.experimental.pallas import tpu as pltpu

# ---------------- synthetic config (small shapes) ----------------
B = 2
TEXT_LEN = 8
VOCAB = 32
TEXT_OUT = 32

AUDIO_T, AUDIO_IN = 8, 16
VIDEO_T, VIDEO_IN = 8, 32
A_HID, V_HID = 32, 32
AUDIO_OUT, VIDEO_OUT = 16, 16

POST_FUSION_DIM = 32
POST_TEXT_DIM = 16
POST_AUDIO_DIM = 16
POST_VIDEO_DIM = 16
EXPERT_DIM = 8

FEATS_W = TEXT_OUT + AUDIO_OUT + VIDEO_OUT          # 64
FUSION_IN = 3 * FEATS_W                             # 192
H1_W = POST_FUSION_DIM + POST_TEXT_DIM + POST_AUDIO_DIM + POST_VIDEO_DIM  # 80
HEADS_W = 4                                         # [M, T, A, V]
EXPERTS_W = 4 * EXPERT_DIM                          # 32
PACK_W = 128                                        # lane-dense packed output


# =====================================================================
# Kernel 1: both AuViSubNet LSTMs (final hidden state), grid over modality
# =====================================================================
def _lstm_kernel(x_ref, len_ref, wih_ref, whh_ref, b_ref, h_out_ref):
    # x_ref: (T, B, D)  time-major;  len_ref: (B, 1) int32
    T, Bk, _ = x_ref.shape
    H = whh_ref.shape[0]

    wih = wih_ref[...]            # (D, 4H)
    whh = whh_ref[...]            # (H, 4H)
    b = b_ref[...]                # (1, 4H)
    lengths = len_ref[...]        # (B, 1) int32

    # Hoist the input projection off the serial recurrence: only h @ whh has to
    # sit on the critical path.  T is static, so everything is fully unrolled.
    xw = [jnp.dot(x_ref[t], wih, preferred_element_type=jnp.float32) + b
          for t in range(T)]

    h = jnp.zeros((Bk, H), jnp.float32)
    c = jnp.zeros((Bk, H), jnp.float32)
    for t in range(T):
        gates = xw[t] + jnp.dot(h, whh, preferred_element_type=jnp.float32)
        i = jax.nn.sigmoid(gates[:, 0:H])
        f = jax.nn.sigmoid(gates[:, H:2 * H])
        g = jnp.tanh(gates[:, 2 * H:3 * H])
        o = jax.nn.sigmoid(gates[:, 3 * H:4 * H])
        c_new = f * c + i * g
        h_new = o * jnp.tanh(c_new)
        # pack_padded_sequence semantics: state frozen once t >= length
        keep = lengths > t
        h = jnp.where(keep, h_new, h)
        c = jnp.where(keep, c_new, c)
    h_out_ref[...] = h


def lstm_pair_final_hidden(x_stacked, len_stacked, wih_stacked, whh_stacked,
                           b_stacked):
    """x_stacked: (2, T, B, D). Returns final hidden states (2, B, H)."""
    M, T, Bk, D = x_stacked.shape
    H = whh_stacked.shape[1]
    return pl.pallas_call(
        _lstm_kernel,
        out_shape=jax.ShapeDtypeStruct((M, Bk, H), jnp.float32),
        grid=(M,),
        in_specs=[
            pl.BlockSpec((None, T, Bk, D), lambda m: (m, 0, 0, 0)),
            pl.BlockSpec((None, Bk, 1), lambda m: (m, 0, 0)),
            pl.BlockSpec((None, D, 4 * H), lambda m: (m, 0, 0)),
            pl.BlockSpec((None, H, 4 * H), lambda m: (m, 0, 0)),
            pl.BlockSpec((None, 1, 4 * H), lambda m: (m, 0, 0)),
        ],
        out_specs=pl.BlockSpec((None, Bk, H), lambda m: (m, 0, 0)),
        compiler_params=pltpu.CompilerParams(
            dimension_semantics=("parallel",)),
    )(x_stacked, len_stacked, wih_stacked, whh_stacked, b_stacked)


# =====================================================================
# Kernel 2: text CLS embedding + cross fusion + all towers/heads, fully fused
# =====================================================================
def _head_kernel(ids_ref, ha_ref, hv_ref,
                 wf_ref, bf_ref, w1_ref, b1_ref, w2_ref, b2_ref,
                 w3_ref, b3_ref, w4_ref, b4_ref, o_ref):
    f32 = jnp.float32
    Bk = ids_ref.shape[0]

    # --- text branch: CLS-token one-hot built in-kernel (BERT stand-in) ---
    ids = ids_ref[...]                                              # (B, 1) int32
    onehot = (jax.lax.broadcasted_iota(jnp.int32, (Bk, VOCAB), 1) == ids
              ).astype(f32)                                         # (B, VOCAB)

    # --- text/audio/video feature projections: one block-diagonal matmul ---
    feats_in = jnp.concatenate([onehot, ha_ref[...], hv_ref[...]], axis=-1)  # (B, 96)
    feats = jnp.dot(feats_in, wf_ref[...], preferred_element_type=f32) + bf_ref[...]
    t = feats[:, :TEXT_OUT]                                         # (B, 32)
    a = feats[:, TEXT_OUT:TEXT_OUT + AUDIO_OUT]                     # (B, 16)
    v = feats[:, TEXT_OUT + AUDIO_OUT:]                             # (B, 16)

    # --- cross bilinear features, built in-register (no HBM concat) ---
    # TA = t*sum(a), AT = a*sum(t), TV = t*sum(v), VT = v*sum(t),
    # AV = a*sum(v), VA = v*sum(a)  (exact equivalent of the torch tile/@ code)
    st = jnp.sum(t, axis=-1, keepdims=True)
    sa = jnp.sum(a, axis=-1, keepdims=True)
    sv = jnp.sum(v, axis=-1, keepdims=True)
    x1 = jnp.concatenate(
        [t, a, v, t * sa, a * st, t * sv, v * st, a * sv, v * sa], axis=-1)  # (B, 192)

    # --- layer 1 (fusion + 3 unimodal), layer 2, scalar heads, expert heads ---
    h1 = jnp.maximum(
        jnp.dot(x1, w1_ref[...], preferred_element_type=f32) + b1_ref[...], 0.0)   # (B, 80)
    h2 = jnp.maximum(
        jnp.dot(h1, w2_ref[...], preferred_element_type=f32) + b2_ref[...], 0.0)   # (B, 80)
    heads = jnp.dot(h2, w3_ref[...], preferred_element_type=f32) + b3_ref[...]      # (B, 4)
    experts = jnp.maximum(
        jnp.dot(h1, w4_ref[...], preferred_element_type=f32) + b4_ref[...], 0.0)    # (B, 32)

    pad = jnp.zeros((Bk, PACK_W - H1_W - HEADS_W - EXPERTS_W), f32)
    # single lane-dense store of the packed (B, 128) result
    o_ref[...] = jnp.concatenate([h1, heads, experts, pad], axis=-1)


def fused_head(ids_cls, h_a, h_v, pk):
    Bk = ids_cls.shape[0]
    return pl.pallas_call(
        _head_kernel,
        out_shape=jax.ShapeDtypeStruct((Bk, PACK_W), jnp.float32),
    )(ids_cls, h_a, h_v,
      pk["w_feat"], pk["b_feat"], pk["w1"], pk["b1"], pk["w2"], pk["b2"],
      pk["w3"], pk["b3"], pk["w4"], pk["b4"])


# ---------------- deterministic parameter init (per-layer, torch-like) ----------------
def _init_linear(key, n_in, n_out, scale=0.1):
    kw, kb = jax.random.split(key)
    w = scale * jax.random.normal(kw, (n_in, n_out), jnp.float32)
    b = scale * jax.random.normal(kb, (n_out,), jnp.float32)
    return w, b


def _init_lstm(key, d_in, hid, scale=0.1):
    k1, k2, k3 = jax.random.split(key, 3)
    w_ih = scale * jax.random.normal(k1, (d_in, 4 * hid), jnp.float32)
    w_hh = scale * jax.random.normal(k2, (hid, 4 * hid), jnp.float32)
    b = scale * jax.random.normal(k3, (4 * hid,), jnp.float32)  # b_ih + b_hh folded
    return w_ih, w_hh, b


def init_params(seed=0):
    keys = jax.random.split(jax.random.PRNGKey(seed), 32)
    p = {}
    p["text_emb_w"], p["text_emb_b"] = _init_linear(keys[0], VOCAB, TEXT_OUT)
    p["a_wih"], p["a_whh"], p["a_b"] = _init_lstm(keys[1], AUDIO_IN, A_HID)
    p["a_lin_w"], p["a_lin_b"] = _init_linear(keys[2], A_HID, AUDIO_OUT)
    p["v_wih"], p["v_whh"], p["v_b"] = _init_lstm(keys[3], VIDEO_IN, V_HID)
    p["v_lin_w"], p["v_lin_b"] = _init_linear(keys[4], V_HID, VIDEO_OUT)
    p["pf1_w"], p["pf1_b"] = _init_linear(keys[5], FUSION_IN, POST_FUSION_DIM)
    p["pf2_w"], p["pf2_b"] = _init_linear(keys[6], POST_FUSION_DIM, POST_FUSION_DIM)
    p["pf3_w"], p["pf3_b"] = _init_linear(keys[7], POST_FUSION_DIM, 1)
    p["pt1_w"], p["pt1_b"] = _init_linear(keys[8], TEXT_OUT, POST_TEXT_DIM)
    p["pt2_w"], p["pt2_b"] = _init_linear(keys[9], POST_TEXT_DIM, POST_TEXT_DIM)
    p["pt3_w"], p["pt3_b"] = _init_linear(keys[10], POST_TEXT_DIM, 1)
    p["pa1_w"], p["pa1_b"] = _init_linear(keys[11], AUDIO_OUT, POST_AUDIO_DIM)
    p["pa2_w"], p["pa2_b"] = _init_linear(keys[12], POST_AUDIO_DIM, POST_AUDIO_DIM)
    p["pa3_w"], p["pa3_b"] = _init_linear(keys[13], POST_AUDIO_DIM, 1)
    p["pv1_w"], p["pv1_b"] = _init_linear(keys[14], VIDEO_OUT, POST_VIDEO_DIM)
    p["pv2_w"], p["pv2_b"] = _init_linear(keys[15], POST_VIDEO_DIM, POST_VIDEO_DIM)
    p["pv3_w"], p["pv3_b"] = _init_linear(keys[16], POST_VIDEO_DIM, 1)
    p["ef_w"], p["ef_b"] = _init_linear(keys[17], POST_FUSION_DIM, EXPERT_DIM)
    p["et_w"], p["et_b"] = _init_linear(keys[18], POST_TEXT_DIM, EXPERT_DIM)
    p["ea_w"], p["ea_b"] = _init_linear(keys[19], POST_AUDIO_DIM, EXPERT_DIM)
    p["ev_w"], p["ev_b"] = _init_linear(keys[20], POST_VIDEO_DIM, EXPERT_DIM)
    return p


def _block_diag(*mats):
    rows = sum(m.shape[0] for m in mats)
    cols = sum(m.shape[1] for m in mats)
    out = jnp.zeros((rows, cols), jnp.float32)
    r = c = 0
    for m in mats:
        out = out.at[r:r + m.shape[0], c:c + m.shape[1]].set(m)
        r += m.shape[0]
        c += m.shape[1]
    return out


def pack_params(p):
    """One-time host-side packing of the per-layer weights for the fused kernels."""
    pk = {}
    # --- stacked LSTM weights (audio input padded 16 -> 32 with zero rows) ---
    a_wih_pad = jnp.zeros((VIDEO_IN, 4 * A_HID), jnp.float32).at[:AUDIO_IN].set(p["a_wih"])
    pk["lstm_wih"] = jnp.stack([a_wih_pad, p["v_wih"]], axis=0)              # (2, 32, 128)
    pk["lstm_whh"] = jnp.stack([p["a_whh"], p["v_whh"]], axis=0)             # (2, 32, 128)
    pk["lstm_b"] = jnp.stack([p["a_b"].reshape(1, -1),
                              p["v_b"].reshape(1, -1)], axis=0)              # (2, 1, 128)
    # --- modality feature projections (text emb / audio linear / video linear) ---
    pk["w_feat"] = _block_diag(p["text_emb_w"], p["a_lin_w"], p["v_lin_w"])  # (96, 64)
    pk["b_feat"] = jnp.concatenate(
        [p["text_emb_b"], p["a_lin_b"], p["v_lin_b"]]).reshape(1, -1)        # (1, 64)
    # --- layer 1: [post_fusion_1 | post_text_1 | post_audio_1 | post_video_1] ---
    uni1 = _block_diag(p["pt1_w"], p["pa1_w"], p["pv1_w"])                   # (64, 48)
    uni1_full = jnp.zeros((FUSION_IN, uni1.shape[1]), jnp.float32).at[:FEATS_W].set(uni1)
    pk["w1"] = jnp.concatenate([p["pf1_w"], uni1_full], axis=1)              # (192, 80)
    pk["b1"] = jnp.concatenate(
        [p["pf1_b"], p["pt1_b"], p["pa1_b"], p["pv1_b"]]).reshape(1, -1)     # (1, 80)
    # --- layer 2 (block-diagonal) ---
    pk["w2"] = _block_diag(p["pf2_w"], p["pt2_w"], p["pa2_w"], p["pv2_w"])   # (80, 80)
    pk["b2"] = jnp.concatenate(
        [p["pf2_b"], p["pt2_b"], p["pa2_b"], p["pv2_b"]]).reshape(1, -1)     # (1, 80)
    # --- scalar heads (M, T, A, V) ---
    pk["w3"] = _block_diag(p["pf3_w"], p["pt3_w"], p["pa3_w"], p["pv3_w"])   # (80, 4)
    pk["b3"] = jnp.concatenate(
        [p["pf3_b"], p["pt3_b"], p["pa3_b"], p["pv3_b"]]).reshape(1, -1)     # (1, 4)
    # --- expert heads (f, t, a, v) ---
    pk["w4"] = _block_diag(p["ef_w"], p["et_w"], p["ea_w"], p["ev_w"])       # (80, 32)
    pk["b4"] = jnp.concatenate(
        [p["ef_b"], p["et_b"], p["ea_b"], p["ev_b"]]).reshape(1, -1)         # (1, 32)
    return pk


# ---------------- TA_GML forward (eval mode), 2 pallas_calls total ----------------
@jax.jit
def ta_gml_forward(packed, text, audio, audio_lengths, video, video_lengths):
    Bk = text.shape[0]

    # mask_len / text_lengths kept for fidelity with the torch forward
    # (unused because need_data_aligned=False).
    mask_len = jnp.sum(text[:, 1, :], axis=1, keepdims=True)
    _text_lengths = jnp.squeeze(mask_len).astype(jnp.int32)

    # --- both AuViSubNet LSTMs in one kernel (audio features padded to video width) ---
    audio_p = jnp.pad(audio.astype(jnp.float32),
                      ((0, 0), (0, 0), (0, VIDEO_IN - AUDIO_IN)))
    x_stacked = jnp.stack([jnp.transpose(audio_p, (1, 0, 2)),
                           jnp.transpose(video.astype(jnp.float32), (1, 0, 2))],
                          axis=0)                                   # (2, T, B, 32)
    len_stacked = jnp.stack([audio_lengths, video_lengths],
                            axis=0).astype(jnp.int32).reshape(2, Bk, 1)
    h_final = lstm_pair_final_hidden(x_stacked, len_stacked,
                                     packed["lstm_wih"], packed["lstm_whh"],
                                     packed["lstm_b"])
    h_a, h_v = h_final[0], h_final[1]

    # --- everything else (text CLS, cross fusion, all towers/heads) in one kernel ---
    ids_cls = text[:, 0, 0].astype(jnp.int32).reshape(Bk, 1)
    y = fused_head(ids_cls, h_a, h_v, packed)

    o = 0
    fusion_h = y[:, o:o + POST_FUSION_DIM]; o += POST_FUSION_DIM
    text_h = y[:, o:o + POST_TEXT_DIM]; o += POST_TEXT_DIM
    audio_h = y[:, o:o + POST_AUDIO_DIM]; o += POST_AUDIO_DIM
    video_h = y[:, o:o + POST_VIDEO_DIM]; o += POST_VIDEO_DIM
    output_fusion = y[:, o:o + 1]
    output_text = y[:, o + 1:o + 2]
    output_audio = y[:, o + 2:o + 3]
    output_video = y[:, o + 3:o + 4]; o += HEADS_W
    e_f = y[:, o:o + EXPERT_DIM]; o += EXPERT_DIM
    e_t = y[:, o:o + EXPERT_DIM]; o += EXPERT_DIM
    e_a = y[:, o:o + EXPERT_DIM]; o += EXPERT_DIM
    e_v = y[:, o:o + EXPERT_DIM]; o += EXPERT_DIM

    return {
        "M": output_fusion, "T": output_text, "A": output_audio, "V": output_video,
        "Feature_t": text_h, "Feature_a": audio_h, "Feature_v": video_h,
        "Feature_f": fusion_h,
        "Expert_f": e_f, "Expert_t": e_t, "Expert_a": e_a, "Expert_v": e_v,
    }


# ---------------- pure-JAX reference (same semantics, unfused) ----------------
def _reference_forward(p, text, audio, audio_lengths, video, video_lengths):
    relu = jax.nn.relu

    def lstm(x, lengths, wih, whh, b):
        Bk, T, _ = x.shape
        H = whh.shape[0]
        h = jnp.zeros((Bk, H), jnp.float32)
        c = jnp.zeros((Bk, H), jnp.float32)
        for t in range(T):
            gates = x[:, t, :] @ wih + h @ whh + b
            i = jax.nn.sigmoid(gates[:, 0:H])
            f = jax.nn.sigmoid(gates[:, H:2 * H])
            g = jnp.tanh(gates[:, 2 * H:3 * H])
            o = jax.nn.sigmoid(gates[:, 3 * H:4 * H])
            c_new = f * c + i * g
            h_new = o * jnp.tanh(c_new)
            m = (lengths > t)[:, None]
            h = jnp.where(m, h_new, h)
            c = jnp.where(m, c_new, c)
        return h

    ids = text[:, 0, 0].astype(jnp.int32)
    text_f = p["text_emb_w"][ids] + p["text_emb_b"]
    h_a = lstm(audio, audio_lengths, p["a_wih"], p["a_whh"], p["a_b"])
    audio_f = h_a @ p["a_lin_w"] + p["a_lin_b"]
    h_v = lstm(video, video_lengths, p["v_wih"], p["v_whh"], p["v_b"])
    video_f = h_v @ p["v_lin_w"] + p["v_lin_b"]

    st = text_f.sum(-1, keepdims=True)
    sa = audio_f.sum(-1, keepdims=True)
    sv = video_f.sum(-1, keepdims=True)
    fusion_in = jnp.concatenate(
        [text_f, audio_f, video_f, text_f * sa, audio_f * st, text_f * sv,
         video_f * st, audio_f * sv, video_f * sa], axis=-1)

    fusion_h = relu(fusion_in @ p["pf1_w"] + p["pf1_b"])
    text_h = relu(text_f @ p["pt1_w"] + p["pt1_b"])
    audio_h = relu(audio_f @ p["pa1_w"] + p["pa1_b"])
    video_h = relu(video_f @ p["pv1_w"] + p["pv1_b"])
    x_f = relu(fusion_h @ p["pf2_w"] + p["pf2_b"]); out_m = x_f @ p["pf3_w"] + p["pf3_b"]
    x_t = relu(text_h @ p["pt2_w"] + p["pt2_b"]); out_t = x_t @ p["pt3_w"] + p["pt3_b"]
    x_a = relu(audio_h @ p["pa2_w"] + p["pa2_b"]); out_a = x_a @ p["pa3_w"] + p["pa3_b"]
    x_v = relu(video_h @ p["pv2_w"] + p["pv2_b"]); out_v = x_v @ p["pv3_w"] + p["pv3_b"]
    e_f = relu(fusion_h @ p["ef_w"] + p["ef_b"])
    e_t = relu(text_h @ p["et_w"] + p["et_b"])
    e_a = relu(audio_h @ p["ea_w"] + p["ea_b"])
    e_v = relu(video_h @ p["ev_w"] + p["ev_b"])
    return {"M": out_m, "T": out_t, "A": out_a, "V": out_v,
            "Feature_t": text_h, "Feature_a": audio_h, "Feature_v": video_h,
            "Feature_f": fusion_h,
            "Expert_f": e_f, "Expert_t": e_t, "Expert_a": e_a, "Expert_v": e_v}


if __name__ == "__main__":
    key = jax.random.PRNGKey(0)
    k_ids, k_a, k_v = jax.random.split(key, 3)

    # text: (B, 3, L) = [input_ids, attention_mask, segment_ids] as floats
    ids = jax.random.randint(k_ids, (B, TEXT_LEN), 0, VOCAB).astype(jnp.float32)
    text_valid = jnp.full((B,), TEXT_LEN, jnp.int32).at[B - 1].set(5)
    attn_mask = (jnp.arange(TEXT_LEN)[None, :] < text_valid[:, None]).astype(jnp.float32)
    segs = jnp.zeros((B, TEXT_LEN), jnp.float32)
    text = jnp.stack([ids, attn_mask, segs], axis=1)                # (2, 3, 8)

    audio = jax.random.normal(k_a, (B, AUDIO_T, AUDIO_IN), jnp.float32)
    audio_lengths = jnp.full((B,), AUDIO_T, jnp.int32).at[B - 1].set(5)
    video = jax.random.normal(k_v, (B, VIDEO_T, VIDEO_IN), jnp.float32)
    video_lengths = jnp.full((B,), VIDEO_T, jnp.int32).at[B - 1].set(6)

    params = init_params(seed=0)
    packed = pack_params(params)

    out = ta_gml_forward(packed, text, audio, audio_lengths, video, video_lengths)
    out = jax.block_until_ready(out)

    # numerical check against an unfused pure-JAX reference of the same module
    ref = _reference_forward(params, text, audio, audio_lengths, video, video_lengths)
    for name in ref:
        assert out[name].shape == ref[name].shape, (name, out[name].shape, ref[name].shape)
        err = float(jnp.max(jnp.abs(out[name] - ref[name])))
        assert err < 2e-4, (name, err)

    assert out["M"].shape == (B, 1)
    assert out["Feature_f"].shape == (B, POST_FUSION_DIM)
    assert out["Expert_t"].shape == (B, EXPERT_DIM)
    print("KERNEL_OK")
</pallas_src>

<mosaic_0001>
module attributes {stable_mosaic.version = 11 : i64} {
  func.func @_lstm_kernel(%arg0: i32, %arg1: memref<1x8x2x32xf32, #tpu.memory_space<vmem>>, %arg2: memref<1x2x1xi32, #tpu.memory_space<vmem>>, %arg3: memref<1x32x128xf32, #tpu.memory_space<vmem>>, %arg4: memref<1x32x128xf32, #tpu.memory_space<vmem>>, %arg5: memref<1x1x128xf32, #tpu.memory_space<vmem>>, %arg6: memref<1x2x32xf32, #tpu.memory_space<vmem>>) attributes {dimension_semantics = [#tpu.dimension_semantics<parallel>], iteration_bounds = array<i64: 2>, scalar_prefetch = 0 : i64, scratch_operands = 0 : i64, tpu.core_type = #tpu.core_type<tc>, window_params = [{transform_indices = @transform_0, window_bounds = array<i64: 1, 8, 2, 32>}, {transform_indices = @transform_1, window_bounds = array<i64: 1, 2, 1>}, {transform_indices = @transform_2, window_bounds = array<i64: 1, 32, 128>}, {transform_indices = @transform_3, window_bounds = array<i64: 1, 32, 128>}, {transform_indices = @transform_4, window_bounds = array<i64: 1, 1, 128>}, {transform_indices = @transform_5, window_bounds = array<i64: 1, 2, 32>}]} {
    %c0 = arith.constant 0 : index
    %c0_0 = arith.constant 0 : index
    %c0_1 = arith.constant 0 : index
    %0 = vector.load %arg3[%c0, %c0_0, %c0_1] : memref<1x32x128xf32, #tpu.memory_space<vmem>>, vector<1x32x128xf32>
    %1 = vector.shape_cast %0 : vector<1x32x128xf32> to vector<32x128xf32>
    %c0_2 = arith.constant 0 : index
    %c0_3 = arith.constant 0 : index
    %c0_4 = arith.constant 0 : index
    %2 = vector.load %arg4[%c0_2, %c0_3, %c0_4] : memref<1x32x128xf32, #tpu.memory_space<vmem>>, vector<1x32x128xf32>
    %3 = vector.shape_cast %2 : vector<1x32x128xf32> to vector<32x128xf32>
    %c0_5 = arith.constant 0 : index
    %c0_6 = arith.constant 0 : index
    %c0_7 = arith.constant 0 : index
    %4 = vector.load %arg5[%c0_5, %c0_6, %c0_7] : memref<1x1x128xf32, #tpu.memory_space<vmem>>, vector<1x1x128xf32>
    %5 = vector.shape_cast %4 : vector<1x1x128xf32> to vector<1x128xf32>
    %c0_8 = arith.constant 0 : index
    %c0_9 = arith.constant 0 : index
    %c0_10 = arith.constant 0 : index
    %6 = vector.load %arg2[%c0_8, %c0_9, %c0_10] : memref<1x2x1xi32, #tpu.memory_space<vmem>>, vector<1x2x1xi32>
    %7 = vector.shape_cast %6 : vector<1x2x1xi32> to vector<2x1xi32>
    %c0_11 = arith.constant 0 : index
    %c0_12 = arith.constant 0 : index
    %c0_13 = arith.constant 0 : index
    %c0_14 = arith.constant 0 : index
    %8 = vector.load %arg1[%c0_11, %c0_12, %c0_13, %c0_14] : memref<1x8x2x32xf32, #tpu.memory_space<vmem>>, vector<1x1x2x32xf32>
    %9 = vector.shape_cast %8 : vector<1x1x2x32xf32> to vector<2x32xf32>
    %cst = arith.constant dense<0.000000e+00> : vector<2x128xf32>
    %10 = tpu.matmul %9, %1, %cst {dimension_numbers = #tpu.dot_dimension_numbers<[1], [0], [0], [1], [0, 0, 1, 1], [], []>} : vector<2x32xf32>, vector<32x128xf32>, vector<2x128xf32> -> vector<2x128xf32>
    %11 = vector.broadcast %5 : vector<1x128xf32> to vector<2x128xf32>
    %12 = arith.addf %10, %11 : vector<2x128xf32>
    %c0_15 = arith.constant 0 : index
    %c1 = arith.constant 1 : index
    %c0_16 = arith.constant 0 : index
    %c0_17 = arith.constant 0 : index
    %13 = vector.load %arg1[%c0_15, %c1, %c0_16, %c0_17] : memref<1x8x2x32xf32, #tpu.memory_space<vmem>>, vector<1x1x2x32xf32>
    %14 = vector.shape_cast %13 : vector<1x1x2x32xf32> to vector<2x32xf32>
    %cst_18 = arith.constant dense<0.000000e+00> : vector<2x128xf32>
    %15 = tpu.matmul %14, %1, %cst_18 {dimension_numbers = #tpu.dot_dimension_numbers<[1], [0], [0], [1], [0, 0, 1, 1], [], []>} : vector<2x32xf32>, vector<32x128xf32>, vector<2x128xf32> -> vector<2x128xf32>
    %16 = vector.broadcast %5 : vector<1x128xf32> to vector<2x128xf32>
    %17 = arith.addf %15, %16 : vector<2x128xf32>
    %c0_19 = arith.constant 0 : index
    %c2 = arith.constant 2 : index
    %c0_20 = arith.constant 0 : index
    %c0_21 = arith.constant 0 : index
    %18 = vector.load %arg1[%c0_19, %c2, %c0_20, %c0_21] : memref<1x8x2x32xf32, #tpu.memory_space<vmem>>, vector<1x1x2x32xf32>
    %19 = vector.shape_cast %18 : vector<1x1x2x32xf32> to vector<2x32xf32>
    %cst_22 = arith.constant dense<0.000000e+00> : vector<2x128xf32>
    %20 = tpu.matmul %19, %1, %cst_22 {dimension_numbers = #tpu.dot_dimension_numbers<[1], [0], [0], [1], [0, 0, 1, 1], [], []>} : vector<2x32xf32>, vector<32x128xf32>, vector<2x128xf32> -> vector<2x128xf32>
    %21 = vector.broadcast %5 : vector<1x128xf32> to vector<2x128xf32>
    %22 = arith.addf %20, %21 : vector<2x128xf32>
    %c0_23 = arith.constant 0 : index
    %c3 = arith.constant 3 : index
    %c0_24 = arith.constant 0 : index
    %c0_25 = arith.constant 0 : index
    %23 = vector.load %arg1[%c0_23, %c3, %c0_24, %c0_25] : memref<1x8x2x32xf32, #tpu.memory_space<vmem>>, vector<1x1x2x32xf32>
    %24 = vector.shape_cast %23 : vector<1x1x2x32xf32> to vector<2x32xf32>
    %cst_26 = arith.constant dense<0.000000e+00> : vector<2x128xf32>
    %25 = tpu.matmul %24, %1, %cst_26 {dimension_numbers = #tpu.dot_dimension_numbers<[1], [0], [0], [1], [0, 0, 1, 1], [], []>} : vector<2x32xf32>, vector<32x128xf32>, vector<2x128xf32> -> vector<2x128xf32>
    %26 = vector.broadcast %5 : vector<1x128xf32> to vector<2x128xf32>
    %27 = arith.addf %25, %26 : vector<2x128xf32>
    %c0_27 = arith.constant 0 : index
    %c4 = arith.constant 4 : index
    %c0_28 = arith.constant 0 : index
    %c0_29 = arith.constant 0 : index
    %28 = vector.load %arg1[%c0_27, %c4, %c0_28, %c0_29] : memref<1x8x2x32xf32, #tpu.memory_space<vmem>>, vector<1x1x2x32xf32>
    %29 = vector.shape_cast %28 : vector<1x1x2x32xf32> to vector<2x32xf32>
    %cst_30 = arith.constant dense<0.000000e+00> : vector<2x128xf32>
    %30 = tpu.matmul %29, %1, %cst_30 {dimension_numbers = #tpu.dot_dimension_numbers<[1], [0], [0], [1], [0, 0, 1, 1], [], []>} : vector<2x32xf32>, vector<32x128xf32>, vector<2x128xf32> -> vector<2x128xf32>
    %31 = vector.broadcast %5 : vector<1x128xf32> to vector<2x128xf32>
    %32 = arith.addf %30, %31 : vector<2x128xf32>
    %c0_31 = arith.constant 0 : index
    %c5 = arith.constant 5 : index
    %c0_32 = arith.constant 0 : index
    %c0_33 = arith.constant 0 : index
    %33 = vector.load %arg1[%c0_31, %c5, %c0_32, %c0_33] : memref<1x8x2x32xf32, #tpu.memory_space<vmem>>, vector<1x1x2x32xf32>
    %34 = vector.shape_cast %33 : vector<1x1x2x32xf32> to vector<2x32xf32>
    %cst_34 = arith.constant dense<0.000000e+00> : vector<2x128xf32>
    %35 = tpu.matmul %34, %1, %cst_34 {dimension_numbers = #tpu.dot_dimension_numbers<[1], [0], [0], [1], [0, 0, 1, 1], [], []>} : vector<2x32xf32>, vector<32x128xf32>, vector<2x128xf32> -> vector<2x128xf32>
    %36 = vector.broadcast %5 : vector<1x128xf32> to vector<2x128xf32>
    %37 = arith.addf %35, %36 : vector<2x128xf32>
    %c0_35 = arith.constant 0 : index
    %c6 = arith.constant 6 : index
    %c0_36 = arith.constant 0 : index
    %c0_37 = arith.constant 0 : index
    %38 = vector.load %arg1[%c0_35, %c6, %c0_36, %c0_37] : memref<1x8x2x32xf32, #tpu.memory_space<vmem>>, vector<1x1x2x32xf32>
    %39 = vector.shape_cast %38 : vector<1x1x2x32xf32> to vector<2x32xf32>
    %cst_38 = arith.constant dense<0.000000e+00> : vector<2x128xf32>
    %40 = tpu.matmul %39, %1, %cst_38 {dimension_numbers = #tpu.dot_dimension_numbers<[1], [0], [0], [1], [0, 0, 1, 1], [], []>} : vector<2x32xf32>, vector<32x128xf32>, vector<2x128xf32> -> vector<2x128xf32>
    %41 = vector.broadcast %5 : vector<1x128xf32> to vector<2x128xf32>
    %42 = arith.addf %40, %41 : vector<2x128xf32>
    %c0_39 = arith.constant 0 : index
    %c7 = arith.constant 7 : index
    %c0_40 = arith.constant 0 : index
    %c0_41 = arith.constant 0 : index
    %43 = vector.load %arg1[%c0_39, %c7, %c0_40, %c0_41] : memref<1x8x2x32xf32, #tpu.memory_space<vmem>>, vector<1x1x2x32xf32>
    %44 = vector.shape_cast %43 : vector<1x1x2x32xf32> to vector<2x32xf32>
    %cst_42 = arith.constant dense<0.000000e+00> : vector<2x128xf32>
    %45 = tpu.matmul %44, %1, %cst_42 {dimension_numbers = #tpu.dot_dimension_numbers<[1], [0], [0], [1], [0, 0, 1, 1], [], []>} : vector<2x32xf32>, vector<32x128xf32>, vector<2x128xf32> -> vector<2x128xf32>
    %46 = vector.broadcast %5 : vector<1x128xf32> to vector<2x128xf32>
    %47 = arith.addf %45, %46 : vector<2x128xf32>
    %cst_43 = arith.constant 0.000000e+00 : f32
    %48 = vector.broadcast %cst_43 : f32 to vector<2x32xf32>
    %cst_44 = arith.constant 0.000000e+00 : f32
    %49 = vector.broadcast %cst_44 : f32 to vector<2x32xf32>
    %cst_45 = arith.constant dense<0.000000e+00> : vector<2x128xf32>
    %50 = tpu.matmul %48, %3, %cst_45 {dimension_numbers = #tpu.dot_dimension_numbers<[1], [0], [0], [1], [0, 0, 1, 1], [], []>} : vector<2x32xf32>, vector<32x128xf32>, vector<2x128xf32> -> vector<2x128xf32>
    %51 = arith.addf %12, %50 : vector<2x128xf32>
    %52 = vector.extract_strided_slice %51 {offsets = [0, 0], sizes = [2, 32], strides = [1, 1]} : vector<2x128xf32> to vector<2x32xf32>
    %53 = arith.negf %52 : vector<2x32xf32>
    %54 = math.exp %53 : vector<2x32xf32>
    %cst_46 = arith.constant 1.000000e+00 : f32
    %55 = vector.broadcast %cst_46 : f32 to vector<2x32xf32>
    %56 = arith.addf %55, %54 : vector<2x32xf32>
    %57 = arith.divf %55, %56 : vector<2x32xf32>
    %58 = vector.extract_strided_slice %51 {offsets = [0, 32], sizes = [2, 32], strides = [1, 1]} : vector<2x128xf32> to vector<2x32xf32>
    %59 = arith.negf %58 : vector<2x32xf32>
    %60 = math.exp %59 : vector<2x32xf32>
    %cst_47 = arith.constant 1.000000e+00 : f32
    %61 = vector.broadcast %cst_47 : f32 to vector<2x32xf32>
    %62 = arith.addf %61, %60 : vector<2x32xf32>
    %63 = arith.divf %61, %62 : vector<2x32xf32>
    %64 = vector.extract_strided_slice %51 {offsets = [0, 64], sizes = [2, 32], strides = [1, 1]} : vector<2x128xf32> to vector<2x32xf32>
    %65 = math.tanh %64 : vector<2x32xf32>
    %66 = vector.extract_strided_slice %51 {offsets = [0, 96], sizes = [2, 32], strides = [1, 1]} : vector<2x128xf32> to vector<2x32xf32>
    %67 = arith.negf %66 : vector<2x32xf32>
    %68 = math.exp %67 : vector<2x32xf32>
    %cst_48 = arith.constant 1.000000e+00 : f32
    %69 = vector.broadcast %cst_48 : f32 to vector<2x32xf32>
    %70 = arith.addf %69, %68 : vector<2x32xf32>
    %71 = arith.divf %69, %70 : vector<2x32xf32>
    %72 = arith.mulf %63, %49 : vector<2x32xf32>
    %73 = arith.mulf %57, %65 : vector<2x32xf32>
    %74 = arith.addf %72, %73 : vector<2x32xf32>
    %75 = math.tanh %74 : vector<2x32xf32>
    %76 = arith.mulf %71, %75 : vector<2x32xf32>
    %c0_i32 = arith.constant 0 : i32
    %77 = vector.broadcast %c0_i32 : i32 to vector<2x1xi32>
    %78 = arith.cmpi sgt, %7, %77 : vector<2x1xi32>
    %79 = vector.shape_cast %78 : vector<2x1xi1> to vector<2x1xi1>
    %80 = vector.broadcast %79 : vector<2x1xi1> to vector<2x32xi1>
    %81 = arith.select %80, %76, %48 : vector<2x32xi1>, vector<2x32xf32>
    %82 = vector.shape_cast %78 : vector<2x1xi1> to vector<2x1xi1>
    %83 = vector.broadcast %82 : vector<2x1xi1> to vector<2x32xi1>
    %84 = arith.select %83, %74, %49 : vector<2x32xi1>, vector<2x32xf32>
    %cst_49 = arith.constant dense<0.000000e+00> : vector<2x128xf32>
    %85 = tpu.matmul %81, %3, %cst_49 {dimension_numbers = #tpu.dot_dimension_numbers<[1], [0], [0], [1], [0, 0, 1, 1], [], []>} : vector<2x32xf32>, vector<32x128xf32>, vector<2x128xf32> -> vector<2x128xf32>
    %86 = arith.addf %17, %85 : vector<2x128xf32>
    %87 = vector.extract_strided_slice %86 {offsets = [0, 0], sizes = [2, 32], strides = [1, 1]} : vector<2x128xf32> to vector<2x32xf32>
    %88 = arith.negf %87 : vector<2x32xf32>
    %89 = math.exp %88 : vector<2x32xf32>
    %cst_50 = arith.constant 1.000000e+00 : f32
    %90 = vector.broadcast %cst_50 : f32 to vector<2x32xf32>
    %91 = arith.addf %90, %89 : vector<2x32xf32>
    %92 = arith.divf %90, %91 : vector<2x32xf32>
    %93 = vector.extract_strided_slice %86 {offsets = [0, 32], sizes = [2, 32], strides = [1, 1]} : vector<2x128xf32> to vector<2x32xf32>
    %94 = arith.negf %93 : vector<2x32xf32>
    %95 = math.exp %94 : vector<2x32xf32>
    %cst_51 = arith.constant 1.000000e+00 : f32
    %96 = vector.broadcast %cst_51 : f32 to vector<2x32xf32>
    %97 = arith.addf %96, %95 : vector<2x32xf32>
    %98 = arith.divf %96, %97 : vector<2x32xf32>
    %99 = vector.extract_strided_slice %86 {offsets = [0, 64], sizes = [2, 32], strides = [1, 1]} : vector<2x128xf32> to vector<2x32xf32>
    %100 = math.tanh %99 : vector<2x32xf32>
    %101 = vector.extract_strided_slice %86 {offsets = [0, 96], sizes = [2, 32], strides = [1, 1]} : vector<2x128xf32> to vector<2x32xf32>
    %102 = arith.negf %101 : vector<2x32xf32>
    %103 = math.exp %102 : vector<2x32xf32>
    %cst_52 = arith.constant 1.000000e+00 : f32
    %104 = vector.broadcast %cst_52 : f32 to vector<2x32xf32>
    %105 = arith.addf %104, %103 : vector<2x32xf32>
    %106 = arith.divf %104, %105 : vector<2x32xf32>
    %107 = arith.mulf %98, %84 : vector<2x32xf32>
    %108 = arith.mulf %92, %100 : vector<2x32xf32>
    %109 = arith.addf %107, %108 : vector<2x32xf32>
    %110 = math.tanh %109 : vector<2x32xf32>
    %111 = arith.mulf %106, %110 : vector<2x32xf32>
    %c1_i32 = arith.constant 1 : i32
    %112 = vector.broadcast %c1_i32 : i32 to vector<2x1xi32>
    %113 = arith.cmpi sgt, %7, %112 : vector<2x1xi32>
    %114 = vector.shape_cast %113 : vector<2x1xi1> to vector<2x1xi1>
    %115 = vector.broadcast %114 : vector<2x1xi1> to vector<2x32xi1>
    %116 = arith.select %115, %111, %81 : vector<2x32xi1>, vector<2x32xf32>
    %117 = vector.shape_cast %113 : vector<2x1xi1> to vector<2x1xi1>
    %118 = vector.broadcast %117 : vector<2x1xi1> to vector<2x32xi1>
    %119 = arith.select %118, %109, %84 : vector<2x32xi1>, vector<2x32xf32>
    %cst_53 = arith.constant dense<0.000000e+00> : vector<2x128xf32>
    %120 = tpu.matmul %116, %3, %cst_53 {dimension_numbers = #tpu.dot_dimension_numbers<[1], [0], [0], [1], [0, 0, 1, 1], [], []>} : vector<2x32xf32>, vector<32x128xf32>, vector<2x128xf32> -> vector<2x128xf32>
    %121 = arith.addf %22, %120 : vector<2x128xf32>
    %122 = vector.extract_strided_slice %121 {offsets = [0, 0], sizes = [2, 32], strides = [1, 1]} : vector<2x128xf32> to vector<2x32xf32>
    %123 = arith.negf %122 : vector<2x32xf32>
    %124 = math.exp %123 : vector<2x32xf32>
    %cst_54 = arith.constant 1.000000e+00 : f32
    %125 = vector.broadcast %cst_54 : f32 to vector<2x32xf32>
    %126 = arith.addf %125, %124 : vector<2x32xf32>
    %127 = arith.divf %125, %126 : vector<2x32xf32>
    %128 = vector.extract_strided_slice %121 {offsets = [0, 32], sizes = [2, 32], strides = [1, 1]} : vector<2x128xf32> to vector<2x32xf32>
    %129 = arith.negf %128 : vector<2x32xf32>
    %130 = math.exp %129 : vector<2x32xf32>
    %cst_55 = arith.constant 1.000000e+00 : f32
    %131 = vector.broadcast %cst_55 : f32 to vector<2x32xf32>
    %132 = arith.addf %131, %130 : vector<2x32xf32>
    %133 = arith.divf %131, %132 : vector<2x32xf32>
    %134 = vector.extract_strided_slice %121 {offsets = [0, 64], sizes = [2, 32], strides = [1, 1]} : vector<2x128xf32> to vector<2x32xf32>
    %135 = math.tanh %134 : vector<2x32xf32>
    %136 = vector.extract_strided_slice %121 {offsets = [0, 96], sizes = [2, 32], strides = [1, 1]} : vector<2x128xf32> to vector<2x32xf32>
    %137 = arith.negf %136 : vector<2x32xf32>
    %138 = math.exp %137 : vector<2x32xf32>
    %cst_56 = arith.constant 1.000000e+00 : f32
    %139 = vector.broadcast %cst_56 : f32 to vector<2x32xf32>
    %140 = arith.addf %139, %138 : vector<2x32xf32>
    %141 = arith.divf %139, %140 : vector<2x32xf32>
    %142 = arith.mulf %133, %119 : vector<2x32xf32>
    %143 = arith.mulf %127, %135 : vector<2x32xf32>
    %144 = arith.addf %142, %143 : vector<2x32xf32>
    %145 = math.tanh %144 : vector<2x32xf32>
    %146 = arith.mulf %141, %145 : vector<2x32xf32>
    %c2_i32 = arith.constant 2 : i32
    %147 = vector.broadcast %c2_i32 : i32 to vector<2x1xi32>
    %148 = arith.cmpi sgt, %7, %147 : vector<2x1xi32>
    %149 = vector.shape_cast %148 : vector<2x1xi1> to vector<2x1xi1>
    %150 = vector.broadcast %149 : vector<2x1xi1> to vector<2x32xi1>
    %151 = arith.select %150, %146, %116 : vector<2x32xi1>, vector<2x32xf32>
    %152 = vector.shape_cast %148 : vector<2x1xi1> to vector<2x1xi1>
    %153 = vector.broadcast %152 : vector<2x1xi1> to vector<2x32xi1>
    %154 = arith.select %153, %144, %119 : vector<2x32xi1>, vector<2x32xf32>
    %cst_57 = arith.constant dense<0.000000e+00> : vector<2x128xf32>
    %155 = tpu.matmul %151, %3, %cst_57 {dimension_numbers = #tpu.dot_dimension_numbers<[1], [0], [0], [1], [0, 0, 1, 1], [], []>} : vector<2x32xf32>, vector<32x128xf32>, vector<2x128xf32> -> vector<2x128xf32>
    %156 = arith.addf %27, %155 : vector<2x128xf32>
    %157 = vector.extract_strided_slice %156 {offsets = [0, 0], sizes = [2, 32], strides = [1, 1]} : vector<2x128xf32> to vector<2x32xf32>
    %158 = arith.negf %157 : vector<2x32xf32>
    %159 = math.exp %158 : vector<2x32xf32>
    %cst_58 = arith.constant 1.000000e+00 : f32
    %160 = vector.broadcast %cst_58 : f32 to vector<2x32xf32>
    %161 = arith.addf %160, %159 : vector<2x32xf32>
    %162 = arith.divf %160, %161 : vector<2x32xf32>
    %163 = vector.extract_strided_slice %156 {offsets = [0, 32], sizes = [2, 32], strides = [1, 1]} : vector<2x128xf32> to vector<2x32xf32>
    %164 = arith.negf %163 : vector<2x32xf32>
    %165 = math.exp %164 : vector<2x32xf32>
    %cst_59 = arith.constant 1.000000e+00 : f32
    %166 = vector.broadcast %cst_59 : f32 to vector<2x32xf32>
    %167 = arith.addf %166, %165 : vector<2x32xf32>
    %168 = arith.divf %166, %167 : vector<2x32xf32>
    %169 = vector.extract_strided_slice %156 {offsets = [0, 64], sizes = [2, 32], strides = [1, 1]} : vector<2x128xf32> to vector<2x32xf32>
    %170 = math.tanh %169 : vector<2x32xf32>
    %171 = vector.extract_strided_slice %156 {offsets = [0, 96], sizes = [2, 32], strides = [1, 1]} : vector<2x128xf32> to vector<2x32xf32>
    %172 = arith.negf %171 : vector<2x32xf32>
    %173 = math.exp %172 : vector<2x32xf32>
    %cst_60 = arith.constant 1.000000e+00 : f32
    %174 = vector.broadcast %cst_60 : f32 to vector<2x32xf32>
    %175 = arith.addf %174, %173 : vector<2x32xf32>
    %176 = arith.divf %174, %175 : vector<2x32xf32>
    %177 = arith.mulf %168, %154 : vector<2x32xf32>
    %178 = arith.mulf %162, %170 : vector<2x32xf32>
    %179 = arith.addf %177, %178 : vector<2x32xf32>
    %180 = math.tanh %179 : vector<2x32xf32>
    %181 = arith.mulf %176, %180 : vector<2x32xf32>
    %c3_i32 = arith.constant 3 : i32
    %182 = vector.broadcast %c3_i32 : i32 to vector<2x1xi32>
    %183 = arith.cmpi sgt, %7, %182 : vector<2x1xi32>
    %184 = vector.shape_cast %183 : vector<2x1xi1> to vector<2x1xi1>
    %185 = vector.broadcast %184 : vector<2x1xi1> to vector<2x32xi1>
    %186 = arith.select %185, %181, %151 : vector<2x32xi1>, vector<2x32xf32>
    %187 = vector.shape_cast %183 : vector<2x1xi1> to vector<2x1xi1>
    %188 = vector.broadcast %187 : vector<2x1xi1> to vector<2x32xi1>
    %189 = arith.select %188, %179, %154 : vector<2x32xi1>, vector<2x32xf32>
    %cst_61 = arith.constant dense<0.000000e+00> : vector<2x128xf32>
    %190 = tpu.matmul %186, %3, %cst_61 {dimension_numbers = #tpu.dot_dimension_numbers<[1], [0], [0], [1], [0, 0, 1, 1], [], []>} : vector<2x32xf32>, vector<32x128xf32>, vector<2x128xf32> -> vector<2x128xf32>
    %191 = arith.addf %32, %190 : vector<2x128xf32>
    %192 = vector.extract_strided_slice %191 {offsets = [0, 0], sizes = [2, 32], strides = [1, 1]} : vector<2x128xf32> to vector<2x32xf32>
    %193 = arith.negf %192 : vector<2x32xf32>
    %194 = math.exp %193 : vector<2x32xf32>
    %cst_62 = arith.constant 1.000000e+00 : f32
    %195 = vector.broadcast %cst_62 : f32 to vector<2x32xf32>
    %196 = arith.addf %195, %194 : vector<2x32xf32>
    %197 = arith.divf %195, %196 : vector<2x32xf32>
    %198 = vector.extract_strided_slice %191 {offsets = [0, 32], sizes = [2, 32], strides = [1, 1]} : vector<2x128xf32> to vector<2x32xf32>
    %199 = arith.negf %198 : vector<2x32xf32>
    %200 = math.exp %199 : vector<2x32xf32>
    %cst_63 = arith.constant 1.000000e+00 : f32
    %201 = vector.broadcast %cst_63 : f32 to vector<2x32xf32>
    %202 = arith.addf %201, %200 : vector<2x32xf32>
    %203 = arith.divf %201, %202 : vector<2x32xf32>
    %204 = vector.extract_strided_slice %191 {offsets = [0, 64], sizes = [2, 32], strides = [1, 1]} : vector<2x128xf32> to vector<2x32xf32>
    %205 = math.tanh %204 : vector<2x32xf32>
    %206 = vector.extract_strided_slice %191 {offsets = [0, 96], sizes = [2, 32], strides = [1, 1]} : vector<2x128xf32> to vector<2x32xf32>
    %207 = arith.negf %206 : vector<2x32xf32>
    %208 = math.exp %207 : vector<2x32xf32>
    %cst_64 = arith.constant 1.000000e+00 : f32
    %209 = vector.broadcast %cst_64 : f32 to vector<2x32xf32>
    %210 = arith.addf %209, %208 : vector<2x32xf32>
    %211 = arith.divf %209, %210 : vector<2x32xf32>
    %212 = arith.mulf %203, %189 : vector<2x32xf32>
    %213 = arith.mulf %197, %205 : vector<2x32xf32>
    %214 = arith.addf %212, %213 : vector<2x32xf32>
    %215 = math.tanh %214 : vector<2x32xf32>
    %216 = arith.mulf %211, %215 : vector<2x32xf32>
    %c4_i32 = arith.constant 4 : i32
    %217 = vector.broadcast %c4_i32 : i32 to vector<2x1xi32>
    %218 = arith.cmpi sgt, %7, %217 : vector<2x1xi32>
    %219 = vector.shape_cast %218 : vector<2x1xi1> to vector<2x1xi1>
    %220 = vector.broadcast %219 : vector<2x1xi1> to vector<2x32xi1>
    %221 = arith.select %220, %216, %186 : vector<2x32xi1>, vector<2x32xf32>
    %222 = vector.shape_cast %218 : vector<2x1xi1> to vector<2x1xi1>
    %223 = vector.broadcast %222 : vector<2x1xi1> to vector<2x32xi1>
    %224 = arith.select %223, %214, %189 : vector<2x32xi1>, vector<2x32xf32>
    %cst_65 = arith.constant dense<0.000000e+00> : vector<2x128xf32>
    %225 = tpu.matmul %221, %3, %cst_65 {dimension_numbers = #tpu.dot_dimension_numbers<[1], [0], [0], [1], [0, 0, 1, 1], [], []>} : vector<2x32xf32>, vector<32x128xf32>, vector<2x128xf32> -> vector<2x128xf32>
    %226 = arith.addf %37, %225 : vector<2x128xf32>
    %227 = vector.extract_strided_slice %226 {offsets = [0, 0], sizes = [2, 32], strides = [1, 1]} : vector<2x128xf32> to vector<2x32xf32>
    %228 = arith.negf %227 : vector<2x32xf32>
    %229 = math.exp %228 : vector<2x32xf32>
    %cst_66 = arith.constant 1.000000e+00 : f32
    %230 = vector.broadcast %cst_66 : f32 to vector<2x32xf32>
    %231 = arith.addf %230, %229 : vector<2x32xf32>
    %232 = arith.divf %230, %231 : vector<2x32xf32>
    %233 = vector.extract_strided_slice %226 {offsets = [0, 32], sizes = [2, 32], strides = [1, 1]} : vector<2x128xf32> to vector<2x32xf32>
    %234 = arith.negf %233 : vector<2x32xf32>
    %235 = math.exp %234 : vector<2x32xf32>
    %cst_67 = arith.constant 1.000000e+00 : f32
    %236 = vector.broadcast %cst_67 : f32 to vector<2x32xf32>
    %237 = arith.addf %236, %235 : vector<2x32xf32>
    %238 = arith.divf %236, %237 : vector<2x32xf32>
    %239 = vector.extract_strided_slice %226 {offsets = [0, 64], sizes = [2, 32], strides = [1, 1]} : vector<2x128xf32> to vector<2x32xf32>
    %240 = math.tanh %239 : vector<2x32xf32>
    %241 = vector.extract_strided_slice %226 {offsets = [0, 96], sizes = [2, 32], strides = [1, 1]} : vector<2x128xf32> to vector<2x32xf32>
    %242 = arith.negf %241 : vector<2x32xf32>
    %243 = math.exp %242 : vector<2x32xf32>
    %cst_68 = arith.constant 1.000000e+00 : f32
    %244 = vector.broadcast %cst_68 : f32 to vector<2x32xf32>
    %245 = arith.addf %244, %243 : vector<2x32xf32>
    %246 = arith.divf %244, %245 : vector<2x32xf32>
    %247 = arith.mulf %238, %224 : vector<2x32xf32>
    %248 = arith.mulf %232, %240 : vector<2x32xf32>
    %249 = arith.addf %247, %248 : vector<2x32xf32>
    %250 = math.tanh %249 : vector<2x32xf32>
    %251 = arith.mulf %246, %250 : vector<2x32xf32>
    %c5_i32 = arith.constant 5 : i32
    %252 = vector.broadcast %c5_i32 : i32 to vector<2x1xi32>
    %253 = arith.cmpi sgt, %7, %252 : vector<2x1xi32>
    %254 = vector.shape_cast %253 : vector<2x1xi1> to vector<2x1xi1>
    %255 = vector.broadcast %254 : vector<2x1xi1> to vector<2x32xi1>
    %256 = arith.select %255, %251, %221 : vector<2x32xi1>, vector<2x32xf32>
    %257 = vector.shape_cast %253 : vector<2x1xi1> to vector<2x1xi1>
    %258 = vector.broadcast %257 : vector<2x1xi1> to vector<2x32xi1>
    %259 = arith.select %258, %249, %224 : vector<2x32xi1>, vector<2x32xf32>
    %cst_69 = arith.constant dense<0.000000e+00> : vector<2x128xf32>
    %260 = tpu.matmul %256, %3, %cst_69 {dimension_numbers = #tpu.dot_dimension_numbers<[1], [0], [0], [1], [0, 0, 1, 1], [], []>} : vector<2x32xf32>, vector<32x128xf32>, vector<2x128xf32> -> vector<2x128xf32>
    %261 = arith.addf %42, %260 : vector<2x128xf32>
    %262 = vector.extract_strided_slice %261 {offsets = [0, 0], sizes = [2, 32], strides = [1, 1]} : vector<2x128xf32> to vector<2x32xf32>
    %263 = arith.negf %262 : vector<2x32xf32>
    %264 = math.exp %263 : vector<2x32xf32>
    %cst_70 = arith.constant 1.000000e+00 : f32
    %265 = vector.broadcast %cst_70 : f32 to vector<2x32xf32>
    %266 = arith.addf %265, %264 : vector<2x32xf32>
    %267 = arith.divf %265, %266 : vector<2x32xf32>
    %268 = vector.extract_strided_slice %261 {offsets = [0, 32], sizes = [2, 32], strides = [1, 1]} : vector<2x128xf32> to vector<2x32xf32>
    %269 = arith.negf %268 : vector<2x32xf32>
    %270 = math.exp %269 : vector<2x32xf32>
    %cst_71 = arith.constant 1.000000e+00 : f32
    %271 = vector.broadcast %cst_71 : f32 to vector<2x32xf32>
    %272 = arith.addf %271, %270 : vector<2x32xf32>
    %273 = arith.divf %271, %272 : vector<2x32xf32>
    %274 = vector.extract_strided_slice %261 {offsets = [0, 64], sizes = [2, 32], strides = [1, 1]} : vector<2x128xf32> to vector<2x32xf32>
    %275 = math.tanh %274 : vector<2x32xf32>
    %276 = vector.extract_strided_slice %261 {offsets = [0, 96], sizes = [2, 32], strides = [1, 1]} : vector<2x128xf32> to vector<2x32xf32>
    %277 = arith.negf %276 : vector<2x32xf32>
    %278 = math.exp %277 : vector<2x32xf32>
    %cst_72 = arith.constant 1.000000e+00 : f32
    %279 = vector.broadcast %cst_72 : f32 to vector<2x32xf32>
    %280 = arith.addf %279, %278 : vector<2x32xf32>
    %281 = arith.divf %279, %280 : vector<2x32xf32>
    %282 = arith.mulf %273, %259 : vector<2x32xf32>
    %283 = arith.mulf %267, %275 : vector<2x32xf32>
    %284 = arith.addf %282, %283 : vector<2x32xf32>
    %285 = math.tanh %284 : vector<2x32xf32>
    %286 = arith.mulf %281, %285 : vector<2x32xf32>
    %c6_i32 = arith.constant 6 : i32
    %287 = vector.broadcast %c6_i32 : i32 to vector<2x1xi32>
    %288 = arith.cmpi sgt, %7, %287 : vector<2x1xi32>
    %289 = vector.shape_cast %288 : vector<2x1xi1> to vector<2x1xi1>
    %290 = vector.broadcast %289 : vector<2x1xi1> to vector<2x32xi1>
    %291 = arith.select %290, %286, %256 : vector<2x32xi1>, vector<2x32xf32>
    %292 = vector.shape_cast %288 : vector<2x1xi1> to vector<2x1xi1>
    %293 = vector.broadcast %292 : vector<2x1xi1> to vector<2x32xi1>
    %294 = arith.select %293, %284, %259 : vector<2x32xi1>, vector<2x32xf32>
    %cst_73 = arith.constant dense<0.000000e+00> : vector<2x128xf32>
    %295 = tpu.matmul %291, %3, %cst_73 {dimension_numbers = #tpu.dot_dimension_numbers<[1], [0], [0], [1], [0, 0, 1, 1], [], []>} : vector<2x32xf32>, vector<32x128xf32>, vector<2x128xf32> -> vector<2x128xf32>
    %296 = arith.addf %47, %295 : vector<2x128xf32>
    %297 = vector.extract_strided_slice %296 {offsets = [0, 0], sizes = [2, 32], strides = [1, 1]} : vector<2x128xf32> to vector<2x32xf32>
    %298 = arith.negf %297 : vector<2x32xf32>
    %299 = math.exp %298 : vector<2x32xf32>
    %cst_74 = arith.constant 1.000000e+00 : f32
    %300 = vector.broadcast %cst_74 : f32 to vector<2x32xf32>
    %301 = arith.addf %300, %299 : vector<2x32xf32>
    %302 = arith.divf %300, %301 : vector<2x32xf32>
    %303 = vector.extract_strided_slice %296 {offsets = [0, 32], sizes = [2, 32], strides = [1, 1]} : vector<2x128xf32> to vector<2x32xf32>
    %304 = arith.negf %303 : vector<2x32xf32>
    %305 = math.exp %304 : vector<2x32xf32>
    %cst_75 = arith.constant 1.000000e+00 : f32
    %306 = vector.broadcast %cst_75 : f32 to vector<2x32xf32>
    %307 = arith.addf %306, %305 : vector<2x32xf32>
    %308 = arith.divf %306, %307 : vector<2x32xf32>
    %309 = vector.extract_strided_slice %296 {offsets = [0, 64], sizes = [2, 32], strides = [1, 1]} : vector<2x128xf32> to vector<2x32xf32>
    %310 = math.tanh %309 : vector<2x32xf32>
    %311 = vector.extract_strided_slice %296 {offsets = [0, 96], sizes = [2, 32], strides = [1, 1]} : vector<2x128xf32> to vector<2x32xf32>
    %312 = arith.negf %311 : vector<2x32xf32>
    %313 = math.exp %312 : vector<2x32xf32>
    %cst_76 = arith.constant 1.000000e+00 : f32
    %314 = vector.broadcast %cst_76 : f32 to vector<2x32xf32>
    %315 = arith.addf %314, %313 : vector<2x32xf32>
    %316 = arith.divf %314, %315 : vector<2x32xf32>
    %317 = arith.mulf %308, %294 : vector<2x32xf32>
    %318 = arith.mulf %302, %310 : vector<2x32xf32>
    %319 = arith.addf %317, %318 : vector<2x32xf32>
    %320 = math.tanh %319 : vector<2x32xf32>
    %321 = arith.mulf %316, %320 : vector<2x32xf32>
    %c7_i32 = arith.constant 7 : i32
    %322 = vector.broadcast %c7_i32 : i32 to vector<2x1xi32>
    %323 = arith.cmpi sgt, %7, %322 : vector<2x1xi32>
    %324 = vector.shape_cast %323 : vector<2x1xi1> to vector<2x1xi1>
    %325 = vector.broadcast %324 : vector<2x1xi1> to vector<2x32xi1>
    %326 = arith.select %325, %321, %291 : vector<2x32xi1>, vector<2x32xf32>
    %c0_77 = arith.constant 0 : index
    %c0_78 = arith.constant 0 : index
    %c0_79 = arith.constant 0 : index
    %327 = vector.load %arg6[%c0_77, %c0_78, %c0_79] : memref<1x2x32xf32, #tpu.memory_space<vmem>>, vector<1x2x32xf32>
    %328 = vector.shape_cast %327 : vector<1x2x32xf32> to vector<2x32xf32>
    %329 = vector.shape_cast %326 : vector<2x32xf32> to vector<1x2x32xf32>
    tpu.vector_store %arg6[%c0_77, %c0_78, %c0_79], %329 {strides = array<i32>} : memref<1x2x32xf32, #tpu.memory_space<vmem>>, vector<1x2x32xf32>,
    return
  }
  func.func @transform_0(%arg0: i32) -> (i32, i32, i32, i32) {
    %c0_i32 = arith.constant 0 : i32
    %c0_i32_0 = arith.constant 0 : i32
    %c0_i32_1 = arith.constant 0 : i32
    %c0_i32_2 = arith.constant 0 : i32
    return %arg0, %c0_i32, %c0_i32_0, %c0_i32_1 : i32, i32, i32, i32
  }
  func.func @transform_1(%arg0: i32) -> (i32, i32, i32) {
    %c0_i32 = arith.constant 0 : i32
    %c0_i32_0 = arith.constant 0 : i32
    %c0_i32_1 = arith.constant 0 : i32
    return %arg0, %c0_i32, %c0_i32_0 : i32, i32, i32
  }
  func.func @transform_2(%arg0: i32) -> (i32, i32, i32) {
    %c0_i32 = arith.constant 0 : i32
    %c0_i32_0 = arith.constant 0 : i32
    %c0_i32_1 = arith.constant 0 : i32
    return %arg0, %c0_i32, %c0_i32_0 : i32, i32, i32
  }
  func.func @transform_3(%arg0: i32) -> (i32, i32, i32) {
    %c0_i32 = arith.constant 0 : i32
    %c0_i32_0 = arith.constant 0 : i32
    %c0_i32_1 = arith.constant 0 : i32
    return %arg0, %c0_i32, %c0_i32_0 : i32, i32, i32
  }
  func.func @transform_4(%arg0: i32) -> (i32, i32, i32) {
    %c0_i32 = arith.constant 0 : i32
    %c0_i32_0 = arith.constant 0 : i32
    %c0_i32_1 = arith.constant 0 : i32
    return %arg0, %c0_i32, %c0_i32_0 : i32, i32, i32
  }
  func.func @transform_5(%arg0: i32) -> (i32, i32, i32) {
    %c0_i32 = arith.constant 0 : i32
    %c0_i32_0 = arith.constant 0 : i32
    %c0_i32_1 = arith.constant 0 : i32
    return %arg0, %c0_i32, %c0_i32_0 : i32, i32, i32
  }
}

module attributes {stable_mosaic.version = 11 : i64} {
  func.func @_head_kernel(%arg0: memref<2x1xi32, #tpu.memory_space<vmem>>, %arg1: memref<2x32xf32, #tpu.memory_space<vmem>>, %arg2: memref<2x32xf32, #tpu.memory_space<vmem>>, %arg3: memref<96x64xf32, #tpu.memory_space<vmem>>, %arg4: memref<1x64xf32, #tpu.memory_space<vmem>>, %arg5: memref<192x80xf32, #tpu.memory_space<vmem>>, %arg6: memref<1x80xf32, #tpu.memory_space<vmem>>, %arg7: memref<80x80xf32, #tpu.memory_space<vmem>>, %arg8: memref<1x80xf32, #tpu.memory_space<vmem>>, %arg9: memref<80x4xf32, #tpu.memory_space<vmem>>, %arg10: memref<1x4xf32, #tpu.memory_space<vmem>>, %arg11: memref<80x32xf32, #tpu.memory_space<vmem>>, %arg12: memref<1x32xf32, #tpu.memory_space<vmem>>, %arg13: memref<2x128xf32, #tpu.memory_space<vmem>>) attributes {dimension_semantics = [], scalar_prefetch = 0 : i64, scratch_operands = 0 : i64, tpu.core_type = #tpu.core_type<tc>} {
    %c0 = arith.constant 0 : index
    %c0_0 = arith.constant 0 : index
    %0 = vector.load %arg0[%c0, %c0_0] : memref<2x1xi32, #tpu.memory_space<vmem>>, vector<2x1xi32>
    %1 = tpu.iota {dimensions = array<i32: 1>} : vector<2x32xi32>
    %2 = vector.broadcast %0 : vector<2x1xi32> to vector<2x32xi32>
    %3 = arith.cmpi eq, %1, %2 : vector<2x32xi32>
    %4 = arith.extui %3 : vector<2x32xi1> to vector<2x32xi32>
    %5 = arith.sitofp %4 : vector<2x32xi32> to vector<2x32xf32>
    %c0_1 = arith.constant 0 : index
    %c0_2 = arith.constant 0 : index
    %6 = vector.load %arg1[%c0_1, %c0_2] : memref<2x32xf32, #tpu.memory_space<vmem>>, vector<2x32xf32>
    %c0_3 = arith.constant 0 : index
    %c0_4 = arith.constant 0 : index
    %7 = vector.load %arg2[%c0_3, %c0_4] : memref<2x32xf32, #tpu.memory_space<vmem>>, vector<2x32xf32>
    %8 = tpu.concatenate %5, %6, %7 in 1 : vector<2x32xf32>, vector<2x32xf32>, vector<2x32xf32> -> vector<2x96xf32>
    %c0_5 = arith.constant 0 : index
    %c0_6 = arith.constant 0 : index
    %9 = vector.load %arg3[%c0_5, %c0_6] : memref<96x64xf32, #tpu.memory_space<vmem>>, vector<96x64xf32>
    %cst = arith.constant dense<0.000000e+00> : vector<2x64xf32>
    %10 = tpu.matmul %8, %9, %cst {dimension_numbers = #tpu.dot_dimension_numbers<[1], [0], [0], [1], [0, 0, 1, 1], [], []>} : vector<2x96xf32>, vector<96x64xf32>, vector<2x64xf32> -> vector<2x64xf32>
    %c0_7 = arith.constant 0 : index
    %c0_8 = arith.constant 0 : index
    %11 = vector.load %arg4[%c0_7, %c0_8] : memref<1x64xf32, #tpu.memory_space<vmem>>, vector<1x64xf32>
    %12 = vector.broadcast %11 : vector<1x64xf32> to vector<2x64xf32>
    %13 = arith.addf %10, %12 : vector<2x64xf32>
    %14 = vector.extract_strided_slice %13 {offsets = [0, 0], sizes = [2, 32], strides = [1, 1]} : vector<2x64xf32> to vector<2x32xf32>
    %15 = vector.extract_strided_slice %13 {offsets = [0, 32], sizes = [2, 16], strides = [1, 1]} : vector<2x64xf32> to vector<2x16xf32>
    %16 = vector.extract_strided_slice %13 {offsets = [0, 48], sizes = [2, 16], strides = [1, 1]} : vector<2x64xf32> to vector<2x16xf32>
    %cst_9 = arith.constant dense<0.000000e+00> : vector<2xf32>
    %17 = vector.multi_reduction <add>, %14, %cst_9 [1] : vector<2x32xf32> to vector<2xf32>
    %18 = vector.shape_cast %17 : vector<2xf32> to vector<2x1xf32>
    %cst_10 = arith.constant dense<0.000000e+00> : vector<2xf32>
    %19 = vector.multi_reduction <add>, %15, %cst_10 [1] : vector<2x16xf32> to vector<2xf32>
    %20 = vector.shape_cast %19 : vector<2xf32> to vector<2x1xf32>
    %cst_11 = arith.constant dense<0.000000e+00> : vector<2xf32>
    %21 = vector.multi_reduction <add>, %16, %cst_11 [1] : vector<2x16xf32> to vector<2xf32>
    %22 = vector.shape_cast %21 : vector<2xf32> to vector<2x1xf32>
    %23 = vector.broadcast %20 : vector<2x1xf32> to vector<2x32xf32>
    %24 = arith.mulf %14, %23 : vector<2x32xf32>
    %25 = vector.broadcast %18 : vector<2x1xf32> to vector<2x16xf32>
    %26 = arith.mulf %15, %25 : vector<2x16xf32>
    %27 = vector.broadcast %22 : vector<2x1xf32> to vector<2x32xf32>
    %28 = arith.mulf %14, %27 : vector<2x32xf32>
    %29 = vector.broadcast %18 : vector<2x1xf32> to vector<2x16xf32>
    %30 = arith.mulf %16, %29 : vector<2x16xf32>
    %31 = vector.broadcast %22 : vector<2x1xf32> to vector<2x16xf32>
    %32 = arith.mulf %15, %31 : vector<2x16xf32>
    %33 = vector.broadcast %20 : vector<2x1xf32> to vector<2x16xf32>
    %34 = arith.mulf %16, %33 : vector<2x16xf32>
    %35 = tpu.concatenate %14, %15, %16, %24, %26, %28, %30, %32, %34 in 1 : vector<2x32xf32>, vector<2x16xf32>, vector<2x16xf32>, vector<2x32xf32>, vector<2x16xf32>, vector<2x32xf32>, vector<2x16xf32>, vector<2x16xf32>, vector<2x16xf32> -> vector<2x192xf32>
    %c0_12 = arith.constant 0 : index
    %c0_13 = arith.constant 0 : index
    %36 = vector.load %arg5[%c0_12, %c0_13] : memref<192x80xf32, #tpu.memory_space<vmem>>, vector<192x80xf32>
    %cst_14 = arith.constant dense<0.000000e+00> : vector<2x80xf32>
    %37 = tpu.matmul %35, %36, %cst_14 {dimension_numbers = #tpu.dot_dimension_numbers<[1], [0], [0], [1], [0, 0, 1, 1], [], []>} : vector<2x192xf32>, vector<192x80xf32>, vector<2x80xf32> -> vector<2x80xf32>
    %c0_15 = arith.constant 0 : index
    %c0_16 = arith.constant 0 : index
    %38 = vector.load %arg6[%c0_15, %c0_16] : memref<1x80xf32, #tpu.memory_space<vmem>>, vector<1x80xf32>
    %39 = vector.broadcast %38 : vector<1x80xf32> to vector<2x80xf32>
    %40 = arith.addf %37, %39 : vector<2x80xf32>
    %cst_17 = arith.constant 0.000000e+00 : f32
    %41 = vector.broadcast %cst_17 : f32 to vector<2x80xf32>
    %42 = arith.maximumf %40, %41 : vector<2x80xf32>
    %c0_18 = arith.constant 0 : index
    %c0_19 = arith.constant 0 : index
    %43 = vector.load %arg7[%c0_18, %c0_19] : memref<80x80xf32, #tpu.memory_space<vmem>>, vector<80x80xf32>
    %cst_20 = arith.constant dense<0.000000e+00> : vector<2x80xf32>
    %44 = tpu.matmul %42, %43, %cst_20 {dimension_numbers = #tpu.dot_dimension_numbers<[1], [0], [0], [1], [0, 0, 1, 1], [], []>} : vector<2x80xf32>, vector<80x80xf32>, vector<2x80xf32> -> vector<2x80xf32>
    %c0_21 = arith.constant 0 : index
    %c0_22 = arith.constant 0 : index
    %45 = vector.load %arg8[%c0_21, %c0_22] : memref<1x80xf32, #tpu.memory_space<vmem>>, vector<1x80xf32>
    %46 = vector.broadcast %45 : vector<1x80xf32> to vector<2x80xf32>
    %47 = arith.addf %44, %46 : vector<2x80xf32>
    %cst_23 = arith.constant 0.000000e+00 : f32
    %48 = vector.broadcast %cst_23 : f32 to vector<2x80xf32>
    %49 = arith.maximumf %47, %48 : vector<2x80xf32>
    %c0_24 = arith.constant 0 : index
    %c0_25 = arith.constant 0 : index
    %50 = vector.load %arg9[%c0_24, %c0_25] : memref<80x4xf32, #tpu.memory_space<vmem>>, vector<80x4xf32>
    %cst_26 = arith.constant dense<0.000000e+00> : vector<2x4xf32>
    %51 = tpu.matmul %49, %50, %cst_26 {dimension_numbers = #tpu.dot_dimension_numbers<[1], [0], [0], [1], [0, 0, 1, 1], [], []>} : vector<2x80xf32>, vector<80x4xf32>, vector<2x4xf32> -> vector<2x4xf32>
    %c0_27 = arith.constant 0 : index
    %c0_28 = arith.constant 0 : index
    %52 = vector.load %arg10[%c0_27, %c0_28] : memref<1x4xf32, #tpu.memory_space<vmem>>, vector<1x4xf32>
    %53 = vector.broadcast %52 : vector<1x4xf32> to vector<2x4xf32>
    %54 = arith.addf %51, %53 : vector<2x4xf32>
    %c0_29 = arith.constant 0 : index
    %c0_30 = arith.constant 0 : index
    %55 = vector.load %arg11[%c0_29, %c0_30] : memref<80x32xf32, #tpu.memory_space<vmem>>, vector<80x32xf32>
    %cst_31 = arith.constant dense<0.000000e+00> : vector<2x32xf32>
    %56 = tpu.matmul %42, %55, %cst_31 {dimension_numbers = #tpu.dot_dimension_numbers<[1], [0], [0], [1], [0, 0, 1, 1], [], []>} : vector<2x80xf32>, vector<80x32xf32>, vector<2x32xf32> -> vector<2x32xf32>
    %c0_32 = arith.constant 0 : index
    %c0_33 = arith.constant 0 : index
    %57 = vector.load %arg12[%c0_32, %c0_33] : memref<1x32xf32, #tpu.memory_space<vmem>>, vector<1x32xf32>
    %58 = vector.broadcast %57 : vector<1x32xf32> to vector<2x32xf32>
    %59 = arith.addf %56, %58 : vector<2x32xf32>
    %cst_34 = arith.constant 0.000000e+00 : f32
    %60 = vector.broadcast %cst_34 : f32 to vector<2x32xf32>
    %61 = arith.maximumf %59, %60 : vector<2x32xf32>
    %cst_35 = arith.constant 0.000000e+00 : f32
    %62 = vector.broadcast %cst_35 : f32 to vector<2x12xf32>
    %63 = tpu.concatenate %42, %54, %61, %62 in 1 : vector<2x80xf32>, vector<2x4xf32>, vector<2x32xf32>, vector<2x12xf32> -> vector<2x128xf32>
    %c0_36 = arith.constant 0 : index
    %c0_37 = arith.constant 0 : index
    %64 = vector.load %arg13[%c0_36, %c0_37] : memref<2x128xf32, #tpu.memory_space<vmem>>, vector<2x128xf32>
    tpu.vector_store %arg13[%c0_36, %c0_37], %63 {strides = array<i32>} : memref<2x128xf32, #tpu.memory_space<vmem>>, vector<2x128xf32>,
    return
  }
}

</mosaic_0001>

<bundles_post_ra>
// kernel: ta_gml_forward.3
= control target key start
LH: loop header
LB: loop body
LE: loop exit
PB: predicated region body
PF: predicated region fallthrough
CT: control target
= control target key end

     0   :  { %v866_v0 = vmov 0   ;;  %v867_v3 = vmov 0.0|0.0   ;;  %s868_s29 = smov 64   ;;  %s869_s21 = smov 32   ;;  %vm870_vm0 = vmmov 0   ;;  %v871_v13 = vmov 0.0   ;;  %s1243_s0 = inlined_call_operand.vmem [shape: s32[2,1], index: 0, kind: input, shape index: {}]   ;;  %s1244_s1 = inlined_call_operand.vmem [shape: f32[2,32], index: 1, kind: input, shape index: {}]   ;;  %s1245_s2 = inlined_call_operand.vmem [shape: f32[2,32], index: 2, kind: input, shape index: {}]   ;;  %s1246_s3 = inlined_call_operand.vmem [shape: f32[96,64], index: 3, kind: input, shape index: {}]   ;;  %s1247_s4 = inlined_call_operand.vmem [shape: f32[1,64], index: 4, kind: input, shape index: {}]   ;;  %s1248_s5 = inlined_call_operand.vmem [shape: f32[192,80], index: 5, kind: input, shape index: {}]   ;;  %s1249_s7 = inlined_call_operand.vmem [shape: f32[80,80], index: 7, kind: input, shape index: {}]   ;;  %s1250_s11 = inlined_call_operand.vmem [shape: f32[80,32], index: 11, kind: input, shape index: {}]   ;;  %s1251_s6 = inlined_call_operand.vmem [shape: f32[1,80], index: 6, kind: input, shape index: {}]   ;;  %s1252_s9 = inlined_call_operand.vmem [shape: f32[80,4], index: 9, kind: input, shape index: {}]   ;;  %s1253_s8 = inlined_call_operand.vmem [shape: f32[1,80], index: 8, kind: input, shape index: {}]   ;;  %s1254_s12 = inlined_call_operand.vmem [shape: f32[1,32], index: 12, kind: input, shape index: {}]   ;;  %s1255_s10 = inlined_call_operand.vmem [shape: f32[1,4], index: 10, kind: input, shape index: {}]   ;;  %s1256_s13 = inlined_call_operand.vmem [shape: f32[2,128], index: 13, kind: output, shape index: {}]  }
   0x1   :  { %860 = vset.pattern.permute.xlu0 %v866_v0  ;;  %v44_v1 = vld [vmem:[%s1243_s0] sm:$0x3]  ;;  %751 = vmatprep.subr.bf16.mxu0 %v867_v3  ;;  %v68_v5 = vld [vmem:[%s1246_s3 + $0x8] sm:$0xff]  ;;  %v69_v6 = vld [vmem:[%s1246_s3 + $0x10] sm:$0xff]  ;;  %v45_v24 = vlaneseq  ;;  %vm63_vm2 = vcmask 261120   ;;  %vm65_vm3 = vcmask 523264  }
   0x2   :  { %v54_v2 = vld [vmem:[%s1245_s2] sm:$0x3]  ;;  %48 = vperm.xlu0 %860, %v44_v1   ;;  %v70_v9 = vld [vmem:[%s1246_s3 + $0x18] sm:$0xff]  ;;  %769 = vmatprep.subr.bf16.mxu1 %v867_v3  ;;  %v72_v12 = vld [vmem:[%s1246_s3 + $0x28] sm:$0xff]  ;;  %vm86_vm4 = vcmask 785408   ;;  %s872_s20 = smov 96  }
   0x3   :  { %60 = vrot.lane.b32.xlu1 %v54_v2, %s868_s29  ;;  %v67_v4 = vld [vmem:[%s1246_s3] sm:$0xff]  ;;  %v755_v10 = vpack.c.bf16 %v70_v9, %v69_v6  ;;  %679 = vmatprep.mubr.msk.f32.mxu0 %vm870_vm0, %v871_v13  ;;  %v73_v15 = vld [vmem:[%s1246_s3 + $0x30] sm:$0xff]  ;;  %v74_v16 = vld [vmem:[%s1246_s3 + $0x38] sm:$0xff]  ;;  %v46_v25 = vand.u32 127, %v45_v24  ;;  %vm160_vm5 = vcmask 254976   ;;  %vm168_vm6 = vcmask 123904  }
   0x4   :  { %v53_v7 = vld [vmem:[%s1244_s1] sm:$0x3]  ;;  %v752_v8 = vpack.c.bf16 %v68_v5, %v67_v4  ;;  %v761_v17 = vpack.c.bf16 %v74_v16, %v73_v15  ;;  %v76_v19 = vld [vmem:[%s1246_s3 + $0x48] sm:$0xff]  ;;  %v77_v21 = vld [vmem:[%s1246_s3 + $0x50] sm:$0xff]  ;;  %s874_s16 = smov 112   ;;  %vm200_vm7 = vcmask 130048  }
   0x5   :  { %v71_v11 = vld [vmem:[%s1246_s3 + $0x20] sm:$0xff]  ;;  %v78_v22 = vld [vmem:[%s1246_s3 + $0x58] sm:$0xff]  ;;  %v206_v42 = vld [vmem:[%s1248_s5 + $0x8] sm:$0xff]  ;;  %vm203_vm8 = vcmask 392192   ;;  %vm198_vm9 = vcmask 916480   ;;  %vm327_vm10 = vcmask 654336  }
   0x6   :  { %753 = vmatpush3.bf16.msra.mxu0 %v752_v8  ;;  %56 = vrot.lane.b32.xlu0 %v53_v7, %s869_s21  ;;  %v758_v14 = vpack.c.bf16 %v72_v12, %v71_v11  ;;  %v75_v18 = vld [vmem:[%s1246_s3 + $0x40] sm:$0xff]  ;;  %v767_v23 = vpack.c.bf16 %v78_v22, %v77_v21  ;;  %s873_s21 = smov 80   ;;  %v207_v43 = vld [vmem:[%s1248_s5 + $0x10] sm:$0xff]  ;;  %v208_v45 = vld [vmem:[%s1248_s5 + $0x18] sm:$0xff]  ;;  %vm589_vm11 = vcmask 687104   ;;  %vm591_vm12 = vcmask 949248  }
   0x7   :  { %754 = vmatprep.subr.bf16.mxu0 %v867_v3  ;;  %v764_v20 = vpack.c.bf16 %v76_v19, %v75_v18  ;;  %v599_v32 = vld [vmem:[%s1247_s4] ss:$0 sm:$0xff]  ;;  %v773_v46 = vpack.c.bf16 %v208_v45, %v207_v43  ;;  %v210_v48 = vld [vmem:[%s1248_s5 + $0x28] sm:$0xff]  ;;  %v211_v50 = vld [vmem:[%s1248_s5 + $0x30] sm:$0xff] }
   0x8   :  { %v205_v41 = vld [vmem:[%s1248_s5] sm:$0xff]  ;;  %v212_v51 = vld [vmem:[%s1248_s5 + $0x38] sm:$0xff]  ;;  %v214_v56 = vld [vmem:[%s1248_s5 + $0x48] sm:$0xff] }
   0x9   :  { %v770_v44 = vpack.c.bf16 %v206_v42, %v205_v41  ;;  %v209_v47 = vld [vmem:[%s1248_s5 + $0x20] sm:$0xff]  ;;  %v779_v54 = vpack.c.bf16 %v212_v51, %v211_v50  ;;  %v215_v58 = vld [vmem:[%s1248_s5 + $0x50] sm:$0xff]  ;;  %v216_v59 = vld [vmem:[%s1248_s5 + $0x58] sm:$0xff] }
   0xa   :  { %756 = vmatpush3.bf16.msra.mxu0 %v755_v10  ;;  %v776_v49 = vpack.c.bf16 %v210_v48, %v209_v47  ;;  %v213_v55 = vld [vmem:[%s1248_s5 + $0x40] sm:$0xff]  ;;  %v785_v60 = vpack.c.bf16 %v216_v59, %v215_v58  ;;  %v218_v62 = vld [vmem:[%s1248_s5 + $0x68] sm:$0xff]  ;;  %v219_v0 = vld [vmem:[%s1248_s5 + $0x70] sm:$0xff] }
   0xb   :  { %757 = vmatprep.subr.bf16.mxu0 %v867_v3  ;;  %771 = vmatpush1.bf16.msra.mxu1 %v770_v44  ;;  %v782_v57 = vpack.c.bf16 %v214_v56, %v213_v55  ;;  %v217_v61 = vld [vmem:[%s1248_s5 + $0x60] sm:$0xff]  ;;  %v220_v1 = vld [vmem:[%s1248_s5 + $0x78] sm:$0xff]  ;;  %v222_v5 = vld [vmem:[%s1248_s5 + $0x88] sm:$0xff] }
   0xc   :  { %772 = vmatprep.subr.bf16.mxu1 %v867_v3  ;;  %v788_v63 = vpack.c.bf16 %v218_v62, %v217_v61  ;;  %v791_v2 = vpack.c.bf16 %v220_v1, %v219_v0  ;;  %v221_v4 = vld [vmem:[%s1248_s5 + $0x80] sm:$0xff]  ;;  %v223_v7 = vld [vmem:[%s1248_s5 + $0x90] sm:$0xff]  ;;  %v224_v8 = vld [vmem:[%s1248_s5 + $0x98] sm:$0xff] }
   0xd   :  { %v794_v6 = vpack.c.bf16 %v222_v5, %v221_v4  ;;  %v797_v9 = vpack.c.bf16 %v224_v8, %v223_v7  ;;  %v225_v10 = vld [vmem:[%s1248_s5 + $0xa0] sm:$0xff]  ;;  %v226_v11 = vld [vmem:[%s1248_s5 + $0xa8] sm:$0xff]  ;;  %v228_v15 = vld [vmem:[%s1248_s5 + $0xb8] sm:$0xff] }
   0xe   :  { %759 = vmatpush3.bf16.msra.mxu0 %v758_v14  ;;  %v800_v12 = vpack.c.bf16 %v226_v11, %v225_v10  ;;  %v227_v14 = vld [vmem:[%s1248_s5 + $0xb0] sm:$0xff]  ;;  %v310_v19 = vld [vmem:[%s1249_s7] sm:$0xff]  ;;  %v493_v42 = vld [vmem:[%s1250_s11 + $0x8] sm:$0xff] }
   0xf   :  { %760 = vmatprep.subr.bf16.mxu0 %v867_v3  ;;  %774 = vmatpush1.bf16.msra.mxu1 %v773_v46  ;;  %v803_v16 = vpack.c.bf16 %v228_v15, %v227_v14  ;;  %v312_v22 = vld [vmem:[%s1249_s7 + $0x10] sm:$0xff]  ;;  %v492_v41 = vld [vmem:[%s1250_s11] sm:$0xff]  ;;  %v499_v55 = vld [vmem:[%s1250_s11 + $0x38] sm:$0xff] }
  0x10   :  { %775 = vmatprep.subr.bf16.mxu1 %v867_v3  ;;  %v836_v46 = vpack.c.bf16 %v493_v42, %v492_v41  ;;  %v494_v48 = vld [vmem:[%s1250_s11 + $0x10] sm:$0xff]  ;;  %v319_v58 = vld [vmem:[%s1249_s7 + $0x48] sm:$0xff]  ;;  %v500_v59 = vld [vmem:[%s1250_s11 + $0x40] sm:$0xff] }
  0x11   :  { %v501_v61 = vld [vmem:[%s1250_s11 + $0x48] sm:$0xff]  ;;  %v402_v0 = vld [vmem:[%s1252_s9] sm:$0xff]  ;;  %v404_v8 = vld [vmem:[%s1252_s9 + $0x10] sm:$0xff] }
  0x12   :  { %762 = vmatpush3.bf16.msra.mxu0 %v761_v17  ;;  %v848_v62 = vpack.c.bf16 %v501_v61, %v500_v59  ;;  %v403_v1 = vld [vmem:[%s1252_s9 + $0x8] sm:$0xff]  ;;  %v406_v11 = vld [vmem:[%s1252_s9 + $0x20] sm:$0xff]  ;;  %v408_v15 = vld [vmem:[%s1252_s9 + $0x30] sm:$0xff] }
  0x13   :  { %763 = vmatprep.subr.bf16.mxu0 %v867_v3  ;;  %777 = vmatpush1.bf16.msra.mxu1 %v776_v49  ;;  %v495_v49 = vld [vmem:[%s1250_s11 + $0x18] sm:$0xff] }
  0x14   :  { %778 = vmatprep.subr.bf16.mxu1 %v867_v3  ;;  %v839_v51 = vpack.c.bf16 %v495_v49, %v494_v48 }
  0x16   :  { %765 = vmatpush3.bf16.msra.mxu0 %v764_v20  ;;  %v311_v20 = vld [vmem:[%s1249_s7 + $0x8] sm:$0xff] }
  0x17   :  { %766 = vmatprep.subr.bf16.mxu0 %v867_v3  ;;  %780 = vmatpush1.bf16.msra.mxu1 %v779_v54  ;;  %v806_v21 = vpack.c.bf16 %v311_v20, %v310_v19  ;;  %v498_v54 = vld [vmem:[%s1250_s11 + $0x30] sm:$0xff]  ;;  %v603_v20 = vld [vmem:[%s1253_s8] ss:$0 sm:$0xff] }
  0x18   :  { %781 = vmatprep.subr.bf16.mxu1 %v867_v3  ;;  %v845_v56 = vpack.c.bf16 %v499_v55, %v498_v54 }
  0x1a   :  { %768 = vmatpush3.bf16.msra.mxu0 %v767_v23  ;;  %v313_v23 = vld [vmem:[%s1249_s7 + $0x18] sm:$0xff] }
  0x1b   :  { %805 = vmatprep.subr.bf16.mxu0 %v867_v3  ;;  %783 = vmatpush1.bf16.msra.mxu1 %v782_v57  ;;  %v318_v57 = vld [vmem:[%s1249_s7 + $0x40] sm:$0xff] }
  0x1c   :  { %784 = vmatprep.subr.bf16.mxu1 %v867_v3 }
  0x1f   :  { %786 = vmatpush1.bf16.msra.mxu1 %v785_v60  ;;  %v818_v60 = vpack.c.bf16 %v319_v58, %v318_v57 }
  0x20   :  { %787 = vmatprep.subr.bf16.mxu1 %v867_v3 }
  0x23   :  { %789 = vmatpush1.bf16.msra.mxu1 %v788_v63  ;;  %v601_v63 = vld [vmem:[%s1251_s6] ss:$0 sm:$0xff] }
  0x24   :  { %790 = vmatprep.subr.bf16.mxu1 %v867_v3 }
  0x27   :  { %792 = vmatpush1.bf16.msra.mxu1 %v791_v2 }
  0x28   :  { %793 = vmatprep.subr.bf16.mxu1 %v867_v3 }
  0x2b   :  { %795 = vmatpush1.bf16.msra.mxu1 %v794_v6  ;;  %v821_v6 = vpack.c.bf16 %v403_v1, %v402_v0 }
  0x2c   :  { %796 = vmatprep.subr.bf16.mxu1 %v867_v3 }
  0x2f   :  { %798 = vmatpush1.bf16.msra.mxu1 %v797_v9  ;;  %v405_v9 = vld [vmem:[%s1252_s9 + $0x18] sm:$0xff] }
  0x30   :  { %799 = vmatprep.subr.bf16.mxu1 %v867_v3  ;;  %v824_v10 = vpack.c.bf16 %v405_v9, %v404_v8 }
  0x33   :  { %801 = vmatpush1.bf16.msra.mxu1 %v800_v12  ;;  %v407_v12 = vld [vmem:[%s1252_s9 + $0x28] sm:$0xff] }
  0x34   :  { %802 = vmatprep.subr.bf16.mxu1 %v867_v3  ;;  %v827_v14 = vpack.c.bf16 %v407_v12, %v406_v11 }
  0x37   :  { %804 = vmatpush1.bf16.msra.mxu1 %v803_v16 }
  0x38   :  { %835 = vmatprep.subr.bf16.mxu1 %v867_v3 }
  0x75   :  { %v61_v27 = vpop.permute.xlu1 %60 }
  0x81   :  { %v49_v26 = vpop.permute.xlu0 %48 }
  0x82   :  { %vm50_vm1 = vcmp.eq.s32.totalorder %v46_v25, %v49_v26  ;;  %v809_v26 = vpack.c.bf16 %v313_v23, %v312_v22 }
  0x83   :  { %v598_v28 = vsel %vm50_vm1, 1.0, %v871_v13 }
  0x85   :  { %v57_v29 = vpop.permute.xlu0 %56 }
  0x86   :  { %v64_v30 = vsel %vm63_vm2, %v598_v28, %v57_v29  ;;  %v314_v28 = vld [vmem:[%s1249_s7 + $0x20] sm:$0xff]  ;;  %v315_v29 = vld [vmem:[%s1249_s7 + $0x28] sm:$0xff] }
  0x87   :  { %v66_v31 = vsel %vm65_vm3, %v64_v30, %v61_v27  ;;  %v812_v30 = vpack.c.bf16 %v315_v29, %v314_v28  ;;  %v605_v29 = vld [vmem:[%s1255_s10] ss:$0 sm:$0xff] }
  0x88   :  { %680 = vmatmul.mubr.msk.f32.vlgmr.msra.gmra.mrb[0].mxu0 %vm86_vm4, %v66_v31  ;;  %v316_v31 = vld [vmem:[%s1249_s7 + $0x30] sm:$0xff] }
  0x89   :  { %702 = vmatprep.mubr.msk.f32.mxu0 %vm870_vm0, %v871_v13  ;;  %807 = vmatpush3.bf16.msra.mxu0 %v806_v21  ;;  %v607_v21 = vld [vmem:[%s1254_s12] ss:$0 sm:$0xff] }
  0x8a   :  { %808 = vmatprep.subr.bf16.mxu0 %v867_v3 }
  0x8d   :  { %810 = vmatpush3.bf16.msra.mxu0 %v809_v26 }
  0x8e   :  { %811 = vmatprep.subr.bf16.mxu0 %v867_v3 }
  0x91   :  { %813 = vmatpush3.bf16.msra.mxu0 %v812_v30 }
  0x92   :  { %814 = vmatprep.subr.bf16.mxu0 %v867_v3 }
 0x15b   :  { %v156_v33 = vpop.f32.mrb[0].mxu0 }
 0x15c   :  { %v1011_v34 = vadd.f32 %v599_v32, %v156_v33  ;;  %v681_v35 = vpop.f32.mrb[1].mxu0  ;;  %v317_v32 = vld [vmem:[%s1249_s7 + $0x38] sm:$0xff] }
 0x15d   :  { %v815_v33 = vpack.c.bf16 %v317_v32, %v316_v31 }
 0x15e   :  { %165 = vrot.lane.b32.xlu0 %v1011_v34, %s872_s20  ;;  %172 = vrot.lane.b32.xlu1 %v1011_v34, %s873_s21  ;;  %v161_v36 = vsel %vm160_vm5, %v1011_v34, 0.0 }
 0x15f   :  { %816 = vmatpush3.bf16.msra.mxu0 %v815_v33 }
 0x160   :  { %817 = vmatprep.subr.bf16.mxu0 %v867_v3 }
 0x163   :  { %819 = vmatpush3.bf16.msra.mxu0 %v818_v60 }
 0x164   :  { %820 = vmatprep.subr.bf16.mxu0 %v867_v3 }
 0x182   :  { %162 = vadd.xlane.f32.xlu1 %v161_v36 }
 0x1d0   :  { %v173_v37 = vpop.permute.xlu1 %172  ;;  %v166_v39 = vpop.permute.xlu0 %165 }
 0x1d1   :  { %v175_v38 = vsel %vm168_vm6, %v173_v37, 0.0  ;;  %v169_v40 = vsel %vm168_vm6, %v166_v39, 0.0 }
 0x1d2   :  { %176 = vadd.xlane.f32.xlu0 %v175_v38 }
 0x1d6   :  { %170 = vadd.xlane.f32.xlu0 %v169_v40 }
 0x20f   :  { %v163_v52 = vpop.xlane.xlu1 %162 }
 0x210   :  { %v1045_v53 = vmul.f32 %v163_v52, %v1011_v34  ;;  %v497_v52 = vld [vmem:[%s1250_s11 + $0x28] sm:$0xff] }
 0x212   :  { %193 = vrot.lane.b32.xlu0 %v1045_v53, %s872_s20  ;;  %s875_s20 = smov 84  }
 0x25f   :  { %v177_v17 = vpop.xlane.xlu0 %176 }
 0x260   :  { %v180_v18 = vmul.f32 %v177_v17, %v1011_v34  ;;  %v410_v17 = vld [vmem:[%s1252_s9 + $0x40] sm:$0xff] }
 0x262   :  { %190 = vrot.lane.b32.xlu1 %v180_v18, %s874_s16 }
 0x263   :  { %v171_v24 = vpop.xlane.xlu0 %170 }
 0x264   :  { %v178_v25 = vmul.f32 %v171_v24, %v1011_v34 }
 0x266   :  { %v861_v27 = vpack.i.bf16 %v1045_v53, %v178_v25 }
 0x268   :  { %862 = vrot.lane.b32.xlu1 %v861_v27, %s868_s29 }
 0x284   :  { %v194_v35 = vpop.permute.xlu0 %193 }
 0x2d4   :  { %v191_v36 = vpop.permute.xlu1 %190 }
 0x2d5   :  { %v201_v37 = vsel %vm200_vm7, %v191_v36, %v194_v35 }
 0x2d6   :  { %v202_v38 = vsel %vm63_vm2, %v201_v37, %v180_v18  ;;  %v411_v18 = vld [vmem:[%s1252_s9 + $0x48] sm:$0xff] }
 0x2d7   :  { %v204_v39 = vsel %vm203_vm8, %v202_v38, %v178_v25  ;;  %v833_v19 = vpack.c.bf16 %v411_v18, %v410_v17 }
 0x2d8   :  { %602 = vmatprep.mubr.msk.f32.mxu1 %vm65_vm3, %v204_v39 }
 0x2da   :  { %v863_v40 = vpop.permute.xlu1 %862 }
 0x2db   :  { %v865_v43 = vunpack.i.h.bf16 %v863_v40  ;;  %v864_v44 = vunpack.i.l.bf16 %v863_v40 }
 0x2dd   :  { %v196_v45 = vsel %vm65_vm3, %v1011_v34, %v864_v44  ;;  %v496_v34 = vld [vmem:[%s1250_s11 + $0x20] sm:$0xff] }
 0x2de   :  { %v197_v47 = vsel %vm86_vm4, %v196_v45, %v865_v43  ;;  %v842_v53 = vpack.c.bf16 %v497_v52, %v496_v34 }
 0x2df   :  { %v199_v50 = vsel %vm198_vm9, %v197_v47, %v191_v36 }
 0x2e0   :  { %304 = vmatmul.mubr.f32.vlgmr.msra.gmra.mrb[0].mxu1 %v199_v50 }
 0x2e1   :  { %837 = vmatpush3.bf16.msra.mxu1 %v836_v46  ;;  %748 = vmatprep.mubr.msk.f32.mxu1 %vm870_vm0, %v871_v13 }
 0x2e2   :  { %838 = vmatprep.subr.bf16.mxu1 %v867_v3 }
 0x2e5   :  { %840 = vmatpush3.bf16.msra.mxu1 %v839_v51 }
 0x2e6   :  { %841 = vmatprep.subr.bf16.mxu1 %v867_v3 }
 0x2e9   :  { %843 = vmatpush3.bf16.msra.mxu1 %v842_v53 }
 0x2ea   :  { %844 = vmatprep.subr.bf16.mxu1 %v867_v3 }
 0x2ed   :  { %846 = vmatpush3.bf16.msra.mxu1 %v845_v56 }
 0x2ee   :  { %847 = vmatprep.subr.bf16.mxu1 %v867_v3 }
 0x2f1   :  { %849 = vmatpush3.bf16.msra.mxu1 %v848_v62 }
 0x3b3   :  { %v305_v2 = vpop.f32.mrb[0].mxu1 }
 0x3b4   :  { %v306_v4 = vadd.f32 %v601_v63, %v305_v2  ;;  %v307_v5 = vpop.f32.mrb[1].mxu1 }
 0x3b6   :  { %v309_v7 = vmax.f32 %v306_v4, 0.0 }
 0x3b8   :  { %703 = vmatmul.mubr.msk.f32.vlgmr.msra.gmra.mrb[2].mxu0 %vm327_vm10, %v309_v7  ;;  %749 = vmatmul.mubr.msk.f32.vlgmr.msra.gmra.mrb[2].mxu1 %vm327_vm10, %v309_v7 }
 0x3b9   :  { %822 = vmatpush3.bf16.msra.mxu0 %v821_v6  ;;  %725 = vmatprep.mubr.msk.f32.mxu0 %vm870_vm0, %v871_v13  ;;  %v409_v13 = vld [vmem:[%s1252_s9 + $0x38] sm:$0xff] }
 0x3ba   :  { %823 = vmatprep.subr.bf16.mxu0 %v867_v3  ;;  %v830_v16 = vpack.c.bf16 %v409_v13, %v408_v15 }
 0x3bd   :  { %825 = vmatpush3.bf16.msra.mxu0 %v824_v10 }
 0x3be   :  { %826 = vmatprep.subr.bf16.mxu0 %v867_v3 }
 0x3c1   :  { %828 = vmatpush3.bf16.msra.mxu0 %v827_v14 }
 0x3c2   :  { %829 = vmatprep.subr.bf16.mxu0 %v867_v3 }
 0x3c5   :  { %831 = vmatpush3.bf16.msra.mxu0 %v830_v16 }
 0x3c6   :  { %832 = vmatprep.subr.bf16.mxu0 %v867_v3 }
 0x3c9   :  { %834 = vmatpush3.bf16.msra.mxu0 %v833_v19 }
 0x48b   :  { %v397_v22 = vpop.f32.mrb[2].mxu0  ;;  %v575_v3 = vpop.f32.mrb[2].mxu1 }
 0x48c   :  { %v398_v23 = vadd.f32 %v603_v20, %v397_v22  ;;  %v576_v24 = vadd.f32 %v607_v21, %v575_v3  ;;  %v704_v25 = vpop.f32.mrb[3].mxu0  ;;  %v750_v26 = vpop.f32.mrb[3].mxu1 }
 0x48e   :  { %v401_v27 = vmax.f32 %v398_v23, 0.0  ;;  %v579_v28 = vmax.f32 %v576_v24, 0.0 }
 0x490   :  { %585 = vrot.lane.b32.xlu0 %v579_v28, %s875_s20  ;;  %726 = vmatmul.mubr.msk.f32.vlgmr.msra.gmra.mrb[4].mxu0 %vm327_vm10, %v401_v27 }
 0x502   :  { %v586_v35 = vpop.permute.xlu0 %585 }
 0x563   :  { %v488_v30 = vpop.f32.mrb[4].mxu0 }
 0x564   :  { %v489_v31 = vadd.f32 %v605_v29, %v488_v30  ;;  %v727_v32 = vpop.f32.mrb[5].mxu0 }
 0x566   :  { %581 = vrot.lane.b32.xlu1 %v489_v31, %s873_s21 }
 0x5d8   :  { %v582_v33 = vpop.permute.xlu1 %581 }
 0x5d9   :  { %v588_v36 = vsel %vm327_vm10, %v309_v7, %v582_v33 }
 0x5da   :  { %v590_v37 = vsel %vm589_vm11, %v588_v36, %v586_v35 }
 0x5db   :  { %v592_v38 = vsel %vm591_vm12, %v590_v37, 0.0 }
 0x5dc   :  { %593 = vst [vmem:[%s1256_s13] sm:$0x3] %v592_v38 }

// kernel: ta_gml_forward.2
= control target key start
LH: loop header
LB: loop body
LE: loop exit
PB: predicated region body
PF: predicated region fallthrough
CT: control target
= control target key end

     0   :  { %s2424_s18 = smov 0   ;;  %s2677_s0 = inlined_call_operand.vmem [shape: f32[2,8,2,32], index: 0, kind: input, shape index: {}]   ;;  %s2678_s1 = inlined_call_operand.vmem [shape: s32[2,2,1], index: 1, kind: input, shape index: {}]   ;;  %s2679_s2 = inlined_call_operand.vmem [shape: f32[2,32,128], index: 2, kind: input, shape index: {}]   ;;  %s2680_s3 = inlined_call_operand.vmem [shape: f32[2,32,128], index: 3, kind: input, shape index: {}]   ;;  %s2681_s4 = inlined_call_operand.vmem [shape: f32[2,1,128], index: 4, kind: input, shape index: {}]   ;;  %s2682_s5 = inlined_call_operand.vmem [shape: f32[2,2,32], index: 5, kind: output, shape index: {}]  }
   0x1 LB: > { %s1875_s19 = sadd.s32 4294967295, %s2386_s18   ;;  %p1879_p0 = scmp.ge.s32.totalorder %s2386_s18, 1  ;;  %s2386_s18 = sphi %s2424_s18, %s15_s18  }
   0x2   : > { %p224_p1 = scmp.lt.s32.totalorder %s2386_s18, 3 }
   0x4   : > { %p225_p2 = pnand %p1879_p0, %p224_p1 }
   0x5   : > { %p268_p3 = scmp.lt.s32.totalorder (!%p225_p2), %s1875_s19, 1  ;;  %v2388_v0 = vmov (!%p225_p2), 0.0|0.0   ;;  %vm2389_vm0 = vmmov (!%p225_p2), 0   ;;  %v2390_v1 = vmov (!%p225_p2), 0.0   ;;  %vm311_vm1 = vcmask (!%p225_p2), 261120   ;;  %s2392_s13 = smov (!%p225_p2), 64  }
   0x6   : > { %228 = sbr.rel (%p225_p2) target bundleno = 5683 (0x1633), region = 40  ;;  %2180 = vmatprep.subr.bf16.mxu0 (!%p225_p2), %v2388_v0  ;;  %2012 = vmatprep.mubr.msk.f32.mxu0 (!%p225_p2), %vm2389_vm0, %v2390_v1  ;;  %v2391_v18 = vmov (!%p225_p2), 0   ;;  %s2393_s14 = smov (!%p225_p2), 32  }
   0x7   : > { %2186 = vmatprep.subr.bf16.mxu1 (!%p225_p2), %v2388_v0  ;;  %2023 = vmatprep.mubr.msk.f32.mxu1 (!%p225_p2), %vm2389_vm0, %v2390_v1 }
   0x8   : > { %2314 = vset.pattern.permute.xlu1 (!%p225_p2), %v2391_v18  ;;  %2315 = vset.pattern.permute.xlu0 (!%p225_p2), %v2391_v18 }
   0xd   : > { %s2684_s19 = smov (!%p268_p3, %s1875_s19), 1 }
   0xe   : > { %s1922_s20 = sshll.u32 %s2684_s19, 5  ;;  %s1921_s24 = sshll.u32 %s2684_s19, 4 }
   0xf   : > { %s281_s23 = scalar_lea.vmem %s2679_s2, %s1922_s20  ;;  %s2457_s27 = scalar_lea.vmem %s2677_s0, %s1921_s24 }
  0x10   : > { %v294_v2 = vld [vmem:[%s281_s23] sm:$0xff]  ;;  %v295_v3 = vld [vmem:[%s281_s23 + $0x8] sm:$0xff]  ;;  %v296_v4 = vld [vmem:[%s281_s23 + $0x10] sm:$0xff]  ;;  %s286_s30 = scalar_lea.vmem %s2680_s3, %s1922_s20  ;;  %s1882_s6 = sshll.u32 %s2684_s19, 1 }
  0x11   : > { %v2446_v5 = vpack.c.bf16 %v295_v3, %v294_v2  ;;  %v297_v6 = vld [vmem:[%s281_s23 + $0x18] sm:$0xff]  ;;  %v304_v8 = vld [vmem:[%s2457_s27] sm:$0x3]  ;;  %v1892_v9 = vld [vmem:[%s2457_s27 + $0x4] sm:$0x3]  ;;  %s276_s9 = scalar_lea.vmem %s2678_s1, %s1882_s6  ;;  %s289_s12 = scalar_lea.vmem %s2681_s4, %s2684_s19 }
  0x12   : > { %v2450_v7 = vpack.c.bf16 %v297_v6, %v296_v4  ;;  %v1896_v10 = vld [vmem:[%s2457_s27 + $0x8] sm:$0x3]  ;;  %v298_v11 = vld [vmem:[%s286_s30] sm:$0xff]  ;;  %v1900_v13 = vld [vmem:[%s2457_s27 + $0xc] sm:$0x3]  ;;  %s293_s17 = scalar_lea.vmem %s2682_s5, %s1882_s6 }
  0x13   : > { %2182 = vmatpush3.bf16.msra.mxu0 %v2446_v5  ;;  %2188 = vmatpush3.bf16.msra.mxu1 %v2446_v5  ;;  %v299_v12 = vld [vmem:[%s286_s30 + $0x8] sm:$0xff]  ;;  %v300_v15 = vld [vmem:[%s286_s30 + $0x10] sm:$0xff]  ;;  %v301_v16 = vld [vmem:[%s286_s30 + $0x18] sm:$0xff] }
  0x14   : > { %2183 = vmatprep.subr.bf16.mxu0 %v2388_v0  ;;  %2189 = vmatprep.subr.bf16.mxu1 %v2388_v0  ;;  %v2493_v14 = vpack.c.bf16 %v299_v12, %v298_v11  ;;  %v2498_v17 = vpack.c.bf16 %v301_v16, %v300_v15  ;;  %v2520_v19 = vld [vmem:[%s276_s9] sm:$0x3]  ;;  %v1890_v35 = vld [vmem:[%s2457_s27 + $0x2] sm:$0x3]  ;;  %v1894_v36 = vld [vmem:[%s2457_s27 + $0x6] sm:$0x3] }
  0x15   : > { %vm1008_vm2 = vcmp.gt.s32.totalorder %v2520_v19, 0  ;;  %v2528_v21 = vld [vmem:[%s289_s12] ss:$0 sm:$0xff]  ;;  %v1898_v38 = vld [vmem:[%s2457_s27 + $0xa] sm:$0x3]  ;;  %vm1116_vm4 = vcmp.gt.s32.totalorder %v2520_v19, 1 }
  0x16   : > { %v1009_v20 = vsel %vm1008_vm2, 1, %v2391_v18  ;;  %v1902_v39 = vld [vmem:[%s2457_s27 + $0xe] sm:$0x3]  ;;  %v1117_v49 = vsel %vm1116_vm4, 1, %v2391_v18  ;;  %vm1224_vm6 = vcmp.gt.s32.totalorder %v2520_v19, 2  ;;  %vm1332_vm8 = vcmp.gt.s32.totalorder %v2520_v19, 3 }
  0x17   : > { %2185 = vmatpush3.bf16.msra.mxu0 %v2450_v7  ;;  %2191 = vmatpush3.bf16.msra.mxu1 %v2450_v7  ;;  %vm1440_vm10 = vcmp.gt.s32.totalorder %v2520_v19, 4  ;;  %vm1548_vm12 = vcmp.gt.s32.totalorder %v2520_v19, 5  ;;  %vm1656_vm14 = vcmp.gt.s32.totalorder %v2520_v19, 6  ;;  %vm1775_vm2 = vcmask 254976  }
  0x18   : > { %2192 = vmatprep.subr.bf16.mxu0 %v2388_v0  ;;  %2198 = vmatprep.subr.bf16.mxu1 %v2388_v0 }
  0x19   : > { %1011 = vperm.xlu1 %2314, %v1009_v20  }
  0x1a   : > { %2013 = vmatmul.mubr.msk.f32.vlgmr.msra.gmra.mrb[0].mxu0 %vm311_vm1, %v304_v8  ;;  %2024 = vmatmul.mubr.msk.f32.vlgmr.msra.gmra.mrb[0].mxu1 %vm311_vm1, %v1890_v35  ;;  %v1225_v8 = vsel %vm1224_vm6, 1, %v2391_v18 }
  0x1b   : > { %2194 = vmatpush3.bf16.msra.mxu0 %v2446_v5  ;;  %2034 = vmatprep.mubr.msk.f32.mxu0 %vm2389_vm0, %v2390_v1 }
  0x1c   : > { %2195 = vmatprep.subr.bf16.mxu0 %v2388_v0  ;;  %2200 = vmatpush3.bf16.msra.mxu1 %v2446_v5 }
  0x1d   : > { %2045 = vmatprep.mubr.msk.f32.mxu1 %vm2389_vm0, %v2390_v1  ;;  %2201 = vmatprep.subr.bf16.mxu1 %v2388_v0 }
  0x1f   : > { %2197 = vmatpush3.bf16.msra.mxu0 %v2450_v7 }
  0x20   : > { %2204 = vmatprep.subr.bf16.mxu0 %v2388_v0  ;;  %2203 = vmatpush3.bf16.msra.mxu1 %v2450_v7 }
  0x21   : > { %2210 = vmatprep.subr.bf16.mxu1 %v2388_v0 }
  0x22   : > { %2035 = vmatmul.mubr.msk.f32.vlgmr.msra.gmra.mrb[2].mxu0 %vm311_vm1, %v1892_v9 }
  0x23   : > { %2206 = vmatpush3.bf16.msra.mxu0 %v2446_v5  ;;  %2056 = vmatprep.mubr.msk.f32.mxu0 %vm2389_vm0, %v2390_v1 }
  0x24   : > { %2207 = vmatprep.subr.bf16.mxu0 %v2388_v0  ;;  %2046 = vmatmul.mubr.msk.f32.vlgmr.msra.gmra.mrb[2].mxu1 %vm311_vm1, %v1894_v36 }
  0x25   : > { %2212 = vmatpush3.bf16.msra.mxu1 %v2446_v5  ;;  %2067 = vmatprep.mubr.msk.f32.mxu1 %vm2389_vm0, %v2390_v1 }
  0x26   : > { %2213 = vmatprep.subr.bf16.mxu1 %v2388_v0 }
  0x27   : > { %2209 = vmatpush3.bf16.msra.mxu0 %v2450_v7 }
  0x28   : > { %2216 = vmatprep.subr.bf16.mxu0 %v2388_v0 }
  0x29   : > { %2215 = vmatpush3.bf16.msra.mxu1 %v2450_v7 }
  0x2a   : > { %2057 = vmatmul.mubr.msk.f32.vlgmr.msra.gmra.mrb[4].mxu0 %vm311_vm1, %v1896_v10  ;;  %2222 = vmatprep.subr.bf16.mxu1 %v2388_v0 }
  0x2b   : > { %2218 = vmatpush3.bf16.msra.mxu0 %v2446_v5  ;;  %2078 = vmatprep.mubr.msk.f32.mxu0 %vm2389_vm0, %v2390_v1 }
  0x2c   : > { %2219 = vmatprep.subr.bf16.mxu0 %v2388_v0  ;;  %2068 = vmatmul.mubr.msk.f32.vlgmr.msra.gmra.mrb[4].mxu1 %vm311_vm1, %v1898_v38 }
  0x2d   : > { %2224 = vmatpush3.bf16.msra.mxu1 %v2446_v5  ;;  %2089 = vmatprep.mubr.msk.f32.mxu1 %vm2389_vm0, %v2390_v1 }
  0x2e   : > { %2225 = vmatprep.subr.bf16.mxu1 %v2388_v0 }
  0x2f   : > { %2221 = vmatpush3.bf16.msra.mxu0 %v2450_v7 }
  0x30   : > { %2228 = vmatprep.subr.bf16.mxu0 %v2388_v0 }
  0x31   : > { %2227 = vmatpush3.bf16.msra.mxu1 %v2450_v7 }
  0x32   : > { %2079 = vmatmul.mubr.msk.f32.vlgmr.msra.gmra.mrb[6].mxu0 %vm311_vm1, %v1900_v13  ;;  %2234 = vmatprep.subr.bf16.mxu1 %v2388_v0 }
  0x33   : > { %2230 = vmatpush3.bf16.msra.mxu0 %v2493_v14  ;;  %2100 = vmatprep.mubr.msk.f32.mxu0 %vm2389_vm0, %v2390_v1 }
  0x34   : > { %2231 = vmatprep.subr.bf16.mxu0 %v2388_v0  ;;  %2090 = vmatmul.mubr.msk.f32.vlgmr.msra.gmra.mrb[6].mxu1 %vm311_vm1, %v1902_v39 }
  0x35   : > { %2236 = vmatpush3.bf16.msra.mxu1 %v2493_v14  ;;  %2111 = vmatprep.mubr.msk.f32.mxu1 %vm2389_vm0, %v2390_v1 }
  0x36   : > { %2237 = vmatprep.subr.bf16.mxu1 %v2388_v0 }
  0x37   : > { %2233 = vmatpush3.bf16.msra.mxu0 %v2498_v17 }
  0x38   : > { %2240 = vmatprep.subr.bf16.mxu0 %v2388_v0 }
  0x39   : > { %2239 = vmatpush3.bf16.msra.mxu1 %v2498_v17 }
  0x3a   : > { %2101 = vmatmul.mubr.f32.vlgmr.msra.gmra.mrb[0].mxu0 %v2390_v1  ;;  %2246 = vmatprep.subr.bf16.mxu1 %v2388_v0 }
  0x3b   : > { %2242 = vmatpush3.bf16.msra.mxu0 %v2493_v14  ;;  %2122 = vmatprep.mubr.msk.f32.mxu0 %vm2389_vm0, %v2390_v1 }
  0x3c   : > { %2243 = vmatprep.subr.bf16.mxu0 %v2388_v0 }
  0x3f   : > { %2245 = vmatpush3.bf16.msra.mxu0 %v2498_v17 }
  0x40   : > { %2252 = vmatprep.subr.bf16.mxu0 %v2388_v0 }
  0x98   : > { %v1012_v40 = vpop.permute.xlu1 %1011 }
  0x99   : > { %vm1013_vm3 = vcmp.eq.s32.totalorder %v1012_v40, 1 }
 0x10d   : > { %v979_v22 = vpop.f32.mrb[0].mxu0 }
 0x10e   : > { %v2276_v23 = vadd.f32 %v2528_v21, %v979_v22  ;;  %v2102_v24 = vpop.f32.mrb[1].mxu0 }
 0x110   : > { %2316 = vtanh.f32 %v2276_v23  ;;  %v1904_v26 = vmul.f32 -1.442695, %v2276_v23 }
 0x112   : > { %2318 = vpow2.f32 %v1904_v26 }
 0x11a   : > { %v2317_v25 = vpop.eup %2316 }
 0x11b   : > { %993 = vrot.lane.b32.xlu0 %v2317_v25, %s2392_s13 }
 0x11c   : > { %v2319_v27 = vpop.eup %2318 }
 0x11d   : > { %v987_v28 = vadd.f32 1.0, %v2319_v27 }
 0x11f   : > { %2320 = vrcp.f32 %v987_v28 }
 0x129   : > { %v2321_v29 = vpop.eup %2320 }
 0x12a   : > { %v991_v32 = vmul.f32 0.0, %v2321_v29 }
 0x18d   : > { %v994_v30 = vpop.permute.xlu0 %993 }
 0x18e   : > { %v996_v31 = vmul.f32 %v2321_v29, %v994_v30 }
 0x190   : > { %998 = vrot.lane.b32.xlu0 %v996_v31, %s2393_s14 }
 0x202   : > { %v999_v33 = vpop.permute.xlu0 %998 }
 0x203   : > { %v2533_v34 = vadd.f32 %v999_v33, %v991_v32 }
 0x205   : > { %2322 = vtanh.f32 %v2533_v34  ;;  %v1015_v56 = vsel %vm1013_vm3, %v2533_v34, 0.0  ;;  %v1333_v34 = vsel %vm1332_vm8, 1, %v2391_v18 }
 0x20f   : > { %v2323_v37 = vpop.eup %2322 }
 0x210   : > { %1004 = vrot.lane.b32.xlu1 %v2323_v37, %s2392_s13 }
 0x282   : > { %v1005_v41 = vpop.permute.xlu1 %1004 }
 0x283   : > { %v1007_v42 = vmul.f32 %v2321_v29, %v1005_v41 }
 0x285   : > { %v1014_v43 = vsel %vm1013_vm3, %v1007_v42, 0.0 }
 0x286   : > { %1017 = vrot.lane.b32.xlu0 %v1014_v43, %s2393_s14 }
 0x2f8   : > { %v1018_v44 = vpop.permute.xlu0 %1017 }
 0x2f9   : > { %2112 = vmatmul.mubr.msk.f32.vlgmr.msra.gmra.mrb[0].mxu1 %vm311_vm1, %v1018_v44 }
 0x2fa   : > { %2248 = vmatpush3.bf16.msra.mxu1 %v2493_v14  ;;  %2133 = vmatprep.mubr.msk.f32.mxu1 %vm2389_vm0, %v2390_v1 }
 0x2fb   : > { %2249 = vmatprep.subr.bf16.mxu1 %v2388_v0 }
 0x2fe   : > { %2251 = vmatpush3.bf16.msra.mxu1 %v2498_v17 }
 0x2ff   : > { %2258 = vmatprep.subr.bf16.mxu1 %v2388_v0 }
 0x3cc   : > { %v1087_v45 = vpop.f32.mrb[0].mxu1 }
 0x3cd   : > { %v2277_v46 = vadd.f32 %v2528_v21, %v1087_v45  ;;  %v2113_v47 = vpop.f32.mrb[1].mxu1 }
 0x3cf   : > { %2324 = vtanh.f32 %v2277_v46  ;;  %v1906_v50 = vmul.f32 -1.442695, %v2277_v46 }
 0x3d1   : > { %2326 = vpow2.f32 %v1906_v50 }
 0x3d9   : > { %v2325_v48 = vpop.eup %2324 }
 0x3da   : > { %1101 = vrot.lane.b32.xlu1 %v2325_v48, %s2392_s13 }
 0x3db   : > { %v2327_v51 = vpop.eup %2326 }
 0x3dc   : > { %v1095_v52 = vadd.f32 1.0, %v2327_v51 }
 0x3de   : > { %1119 = vperm.xlu1 %2314, %v1117_v49   ;;  %2328 = vrcp.f32 %v1095_v52 }
 0x3e8   : > { %v2329_v53 = vpop.eup %2328 }
 0x3e9   : > { %v1099_v57 = vmul.f32 %v2329_v53, %v1015_v56 }
 0x44c   : > { %v1102_v54 = vpop.permute.xlu1 %1101 }
 0x44d   : > { %v1104_v55 = vmul.f32 %v2329_v53, %v1102_v54 }
 0x44f   : > { %1106 = vrot.lane.b32.xlu0 %v1104_v55, %s2393_s14  ;;  %v1441_v55 = vsel %vm1440_vm10, 1, %v2391_v18 }
 0x45d   : > { %v1120_v61 = vpop.permute.xlu1 %1119 }
 0x45e   : > { %vm1121_vm5 = vcmp.eq.s32.totalorder %v1120_v61, 1 }
 0x4c1   : > { %v1107_v58 = vpop.permute.xlu0 %1106 }
 0x4c2   : > { %v1109_v59 = vadd.f32 %v1107_v58, %v1099_v57 }
 0x4c4   : > { %2330 = vtanh.f32 %v1109_v59  ;;  %v1123_v16 = vsel %vm1121_vm5, %v1109_v59, %v1015_v56 }
 0x4ce   : > { %v2331_v60 = vpop.eup %2330 }
 0x4cf   : > { %1112 = vrot.lane.b32.xlu0 %v2331_v60, %s2392_s13 }
 0x541   : > { %v1113_v62 = vpop.permute.xlu0 %1112 }
 0x542   : > { %v1115_v63 = vmul.f32 %v2329_v53, %v1113_v62 }
 0x544   : > { %v1122_v2 = vsel %vm1121_vm5, %v1115_v63, %v1014_v43 }
 0x545   : > { %1125 = vrot.lane.b32.xlu1 %v1122_v2, %s2393_s14 }
 0x5b7   : > { %v1126_v3 = vpop.permute.xlu1 %1125 }
 0x5b8   : > { %2123 = vmatmul.mubr.msk.f32.vlgmr.msra.gmra.mrb[2].mxu0 %vm311_vm1, %v1126_v3 }
 0x5b9   : > { %2254 = vmatpush3.bf16.msra.mxu0 %v2493_v14  ;;  %2144 = vmatprep.mubr.msk.f32.mxu0 %vm2389_vm0, %v2390_v1 }
 0x5ba   : > { %2255 = vmatprep.subr.bf16.mxu0 %v2388_v0 }
 0x5bd   : > { %2257 = vmatpush3.bf16.msra.mxu0 %v2498_v17 }
 0x5be   : > { %2264 = vmatprep.subr.bf16.mxu0 %v2388_v0 }
 0x68b   : > { %v1195_v4 = vpop.f32.mrb[2].mxu0 }
 0x68c   : > { %v2278_v5 = vadd.f32 %v2528_v21, %v1195_v4  ;;  %v2124_v6 = vpop.f32.mrb[3].mxu0 }
 0x68e   : > { %2332 = vtanh.f32 %v2278_v5  ;;  %v1908_v9 = vmul.f32 -1.442695, %v2278_v5 }
 0x690   : > { %2334 = vpow2.f32 %v1908_v9 }
 0x698   : > { %v2333_v7 = vpop.eup %2332 }
 0x699   : > { %1209 = vrot.lane.b32.xlu0 %v2333_v7, %s2392_s13 }
 0x69a   : > { %v2335_v10 = vpop.eup %2334 }
 0x69b   : > { %v1203_v11 = vadd.f32 1.0, %v2335_v10 }
 0x69d   : > { %1227 = vperm.xlu0 %2315, %v1225_v8   ;;  %2336 = vrcp.f32 %v1203_v11 }
 0x6a7   : > { %v2337_v12 = vpop.eup %2336 }
 0x6a8   : > { %v1207_v20 = vmul.f32 %v2337_v12, %v1123_v16 }
 0x70b   : > { %v1210_v13 = vpop.permute.xlu0 %1209 }
 0x70c   : > { %v1212_v15 = vmul.f32 %v2337_v12, %v1210_v13 }
 0x70e   : > { %1214 = vrot.lane.b32.xlu1 %v1212_v15, %s2393_s14  ;;  %v1549_v15 = vsel %vm1548_vm12, 1, %v2391_v18 }
 0x71c   : > { %v1228_v25 = vpop.permute.xlu0 %1227 }
 0x71d   : > { %vm1229_vm7 = vcmp.eq.s32.totalorder %v1228_v25, 1 }
 0x780   : > { %v1215_v22 = vpop.permute.xlu1 %1214 }
 0x781   : > { %v1217_v23 = vadd.f32 %v1215_v22, %v1207_v20 }
 0x783   : > { %2338 = vtanh.f32 %v1217_v23  ;;  %v1231_v41 = vsel %vm1229_vm7, %v1217_v23, %v1123_v16 }
 0x78d   : > { %v2339_v24 = vpop.eup %2338 }
 0x78e   : > { %1220 = vrot.lane.b32.xlu1 %v2339_v24, %s2392_s13 }
 0x800   : > { %v1221_v26 = vpop.permute.xlu1 %1220 }
 0x801   : > { %v1223_v27 = vmul.f32 %v2337_v12, %v1221_v26 }
 0x803   : > { %v1230_v28 = vsel %vm1229_vm7, %v1223_v27, %v1122_v2 }
 0x804   : > { %1233 = vrot.lane.b32.xlu1 %v1230_v28, %s2393_s14 }
 0x876   : > { %v1234_v29 = vpop.permute.xlu1 %1233 }
 0x877   : > { %2134 = vmatmul.mubr.msk.f32.vlgmr.msra.gmra.mrb[2].mxu1 %vm311_vm1, %v1234_v29 }
 0x878   : > { %2260 = vmatpush3.bf16.msra.mxu1 %v2493_v14  ;;  %2155 = vmatprep.mubr.msk.f32.mxu1 %vm2389_vm0, %v2390_v1 }
 0x879   : > { %2261 = vmatprep.subr.bf16.mxu1 %v2388_v0 }
 0x87c   : > { %2263 = vmatpush3.bf16.msra.mxu1 %v2498_v17 }
 0x87d   : > { %2270 = vmatprep.subr.bf16.mxu1 %v2388_v0 }
 0x94a   : > { %v1303_v30 = vpop.f32.mrb[2].mxu1 }
 0x94b   : > { %v2279_v31 = vadd.f32 %v2528_v21, %v1303_v30  ;;  %v2135_v32 = vpop.f32.mrb[3].mxu1 }
 0x94d   : > { %2340 = vtanh.f32 %v2279_v31  ;;  %v1910_v35 = vmul.f32 -1.442695, %v2279_v31 }
 0x94f   : > { %2342 = vpow2.f32 %v1910_v35 }
 0x957   : > { %v2341_v33 = vpop.eup %2340 }
 0x958   : > { %1317 = vrot.lane.b32.xlu0 %v2341_v33, %s2392_s13 }
 0x959   : > { %v2343_v36 = vpop.eup %2342 }
 0x95a   : > { %v1311_v37 = vadd.f32 1.0, %v2343_v36  ;;  %v1657_v36 = vsel %vm1656_vm14, 1, %v2391_v18 }
 0x95c   : > { %1335 = vperm.xlu0 %2315, %v1333_v34   ;;  %2344 = vrcp.f32 %v1311_v37 }
 0x966   : > { %v2345_v38 = vpop.eup %2344 }
 0x967   : > { %v1315_v42 = vmul.f32 %v2345_v38, %v1231_v41 }
 0x9ca   : > { %v1318_v39 = vpop.permute.xlu0 %1317 }
 0x9cb   : > { %v1320_v40 = vmul.f32 %v2345_v38, %v1318_v39 }
 0x9cd   : > { %1322 = vrot.lane.b32.xlu1 %v1320_v40, %s2393_s14 }
 0x9db   : > { %v1336_v46 = vpop.permute.xlu0 %1335 }
 0x9dc   : > { %vm1337_vm9 = vcmp.eq.s32.totalorder %v1336_v46, 1 }
 0xa3f   : > { %v1323_v43 = vpop.permute.xlu1 %1322 }
 0xa40   : > { %v1325_v44 = vadd.f32 %v1323_v43, %v1315_v42 }
 0xa42   : > { %2346 = vtanh.f32 %v1325_v44  ;;  %v1339_v62 = vsel %vm1337_vm9, %v1325_v44, %v1231_v41 }
 0xa4c   : > { %v2347_v45 = vpop.eup %2346 }
 0xa4d   : > { %1328 = vrot.lane.b32.xlu1 %v2347_v45, %s2392_s13 }
 0xabf   : > { %v1329_v47 = vpop.permute.xlu1 %1328 }
 0xac0   : > { %v1331_v48 = vmul.f32 %v2345_v38, %v1329_v47 }
 0xac2   : > { %v1338_v49 = vsel %vm1337_vm9, %v1331_v48, %v1230_v28 }
 0xac3   : > { %1341 = vrot.lane.b32.xlu0 %v1338_v49, %s2393_s14 }
 0xb35   : > { %v1342_v50 = vpop.permute.xlu0 %1341 }
 0xb36   : > { %2145 = vmatmul.mubr.msk.f32.vlgmr.msra.gmra.mrb[4].mxu0 %vm311_vm1, %v1342_v50 }
 0xb37   : > { %2266 = vmatpush3.bf16.msra.mxu0 %v2493_v14  ;;  %2166 = vmatprep.mubr.msk.f32.mxu0 %vm2389_vm0, %v2390_v1 }
 0xb38   : > { %2267 = vmatprep.subr.bf16.mxu0 %v2388_v0 }
 0xb3b   : > { %2269 = vmatpush3.bf16.msra.mxu0 %v2498_v17 }
 0xc09   : > { %v1411_v51 = vpop.f32.mrb[4].mxu0 }
 0xc0a   : > { %v2280_v52 = vadd.f32 %v2528_v21, %v1411_v51  ;;  %v2146_v53 = vpop.f32.mrb[5].mxu0 }
 0xc0c   : > { %2348 = vtanh.f32 %v2280_v52  ;;  %v1912_v56 = vmul.f32 -1.442695, %v2280_v52 }
 0xc0e   : > { %2350 = vpow2.f32 %v1912_v56 }
 0xc16   : > { %v2349_v54 = vpop.eup %2348 }
 0xc17   : > { %1425 = vrot.lane.b32.xlu1 %v2349_v54, %s2392_s13 }
 0xc18   : > { %v2351_v57 = vpop.eup %2350 }
 0xc19   : > { %v1419_v58 = vadd.f32 1.0, %v2351_v57 }
 0xc1b   : > { %1443 = vperm.xlu1 %2314, %v1441_v55   ;;  %2352 = vrcp.f32 %v1419_v58 }
 0xc25   : > { %v2353_v59 = vpop.eup %2352 }
 0xc26   : > { %v1423_v63 = vmul.f32 %v2353_v59, %v1339_v62 }
 0xc89   : > { %v1426_v60 = vpop.permute.xlu1 %1425 }
 0xc8a   : > { %v1428_v61 = vmul.f32 %v2353_v59, %v1426_v60 }
 0xc8c   : > { %1430 = vrot.lane.b32.xlu0 %v1428_v61, %s2393_s14 }
 0xc9a   : > { %v1444_v5 = vpop.permute.xlu1 %1443 }
 0xc9b   : > { %vm1445_vm11 = vcmp.eq.s32.totalorder %v1444_v5, 1 }
 0xcfe   : > { %v1431_v2 = vpop.permute.xlu0 %1430 }
 0xcff   : > { %v1433_v3 = vadd.f32 %v1431_v2, %v1423_v63 }
 0xd01   : > { %2354 = vtanh.f32 %v1433_v3  ;;  %v1447_v22 = vsel %vm1445_vm11, %v1433_v3, %v1339_v62 }
 0xd0b   : > { %v2355_v4 = vpop.eup %2354 }
 0xd0c   : > { %1436 = vrot.lane.b32.xlu0 %v2355_v4, %s2392_s13 }
 0xd7e   : > { %v1437_v6 = vpop.permute.xlu0 %1436 }
 0xd7f   : > { %v1439_v7 = vmul.f32 %v2353_v59, %v1437_v6 }
 0xd81   : > { %v1446_v8 = vsel %vm1445_vm11, %v1439_v7, %v1338_v49 }
 0xd82   : > { %1449 = vrot.lane.b32.xlu1 %v1446_v8, %s2393_s14 }
 0xdf4   : > { %v1450_v9 = vpop.permute.xlu1 %1449 }
 0xdf5   : > { %2156 = vmatmul.mubr.msk.f32.vlgmr.msra.gmra.mrb[4].mxu1 %vm311_vm1, %v1450_v9 }
 0xdf6   : > { %2272 = vmatpush3.bf16.msra.mxu1 %v2493_v14  ;;  %2177 = vmatprep.mubr.msk.f32.mxu1 %vm2389_vm0, %v2390_v1  ;;  %vm1764_vm0 = vcmp.gt.s32.totalorder %v2520_v19, 7 }
 0xdf7   : > { %2273 = vmatprep.subr.bf16.mxu1 %v2388_v0  ;;  %v1765_v57 = vsel %vm1764_vm0, 1, %v2391_v18 }
 0xdfa   : > { %2275 = vmatpush3.bf16.msra.mxu1 %v2498_v17 }
 0xec8   : > { %v1519_v10 = vpop.f32.mrb[4].mxu1 }
 0xec9   : > { %v2281_v11 = vadd.f32 %v2528_v21, %v1519_v10  ;;  %v2157_v12 = vpop.f32.mrb[5].mxu1 }
 0xecb   : > { %2356 = vtanh.f32 %v2281_v11  ;;  %v1914_v14 = vmul.f32 -1.442695, %v2281_v11 }
 0xecd   : > { %2358 = vpow2.f32 %v1914_v14 }
 0xed5   : > { %v2357_v13 = vpop.eup %2356 }
 0xed6   : > { %1533 = vrot.lane.b32.xlu0 %v2357_v13, %s2392_s13 }
 0xed7   : > { %v2359_v1 = vpop.eup %2358 }
 0xed8   : > { %v1527_v16 = vadd.f32 1.0, %v2359_v1 }
 0xeda   : > { %1551 = vperm.xlu0 %2315, %v1549_v15   ;;  %2360 = vrcp.f32 %v1527_v16 }
 0xee4   : > { %v2361_v0 = vpop.eup %2360 }
 0xee5   : > { %v1531_v23 = vmul.f32 %v2361_v0, %v1447_v22 }
 0xf48   : > { %v1534_v17 = vpop.permute.xlu0 %1533 }
 0xf49   : > { %v1536_v20 = vmul.f32 %v2361_v0, %v1534_v17 }
 0xf4b   : > { %1538 = vrot.lane.b32.xlu1 %v1536_v20, %s2393_s14 }
 0xf59   : > { %v1552_v27 = vpop.permute.xlu0 %1551 }
 0xf5a   : > { %vm1553_vm13 = vcmp.eq.s32.totalorder %v1552_v27, 1 }
 0xfbd   : > { %v1539_v24 = vpop.permute.xlu1 %1538 }
 0xfbe   : > { %v1541_v25 = vadd.f32 %v1539_v24, %v1531_v23 }
 0xfc0   : > { %2362 = vtanh.f32 %v1541_v25  ;;  %v1555_v43 = vsel %vm1553_vm13, %v1541_v25, %v1447_v22 }
 0xfca   : > { %v2363_v26 = vpop.eup %2362 }
 0xfcb   : > { %1544 = vrot.lane.b32.xlu1 %v2363_v26, %s2392_s13 }
0x103d   : > { %v1545_v28 = vpop.permute.xlu1 %1544 }
0x103e   : > { %v1547_v29 = vmul.f32 %v2361_v0, %v1545_v28 }
0x1040   : > { %v1554_v30 = vsel %vm1553_vm13, %v1547_v29, %v1446_v8 }
0x1041   : > { %1557 = vrot.lane.b32.xlu0 %v1554_v30, %s2393_s14 }
0x10b3   : > { %v1558_v31 = vpop.permute.xlu0 %1557 }
0x10b4   : > { %2167 = vmatmul.mubr.msk.f32.vlgmr.msra.gmra.mrb[6].mxu0 %vm311_vm1, %v1558_v31 }
0x1187   : > { %v1627_v32 = vpop.f32.mrb[6].mxu0 }
0x1188   : > { %v2282_v33 = vadd.f32 %v2528_v21, %v1627_v32  ;;  %v2168_v34 = vpop.f32.mrb[7].mxu0 }
0x118a   : > { %2364 = vtanh.f32 %v2282_v33  ;;  %v1916_v37 = vmul.f32 -1.442695, %v2282_v33 }
0x118c   : > { %2366 = vpow2.f32 %v1916_v37 }
0x1194   : > { %v2365_v35 = vpop.eup %2364 }
0x1195   : > { %1641 = vrot.lane.b32.xlu1 %v2365_v35, %s2392_s13 }
0x1196   : > { %v2367_v38 = vpop.eup %2366 }
0x1197   : > { %v1635_v39 = vadd.f32 1.0, %v2367_v38 }
0x1199   : > { %1659 = vperm.xlu1 %2314, %v1657_v36   ;;  %2368 = vrcp.f32 %v1635_v39 }
0x11a3   : > { %v2369_v40 = vpop.eup %2368 }
0x11a4   : > { %v1639_v44 = vmul.f32 %v2369_v40, %v1555_v43 }
0x1207   : > { %v1642_v41 = vpop.permute.xlu1 %1641 }
0x1208   : > { %v1644_v42 = vmul.f32 %v2369_v40, %v1642_v41 }
0x120a   : > { %1646 = vrot.lane.b32.xlu0 %v1644_v42, %s2393_s14 }
0x1218   : > { %v1660_v48 = vpop.permute.xlu1 %1659 }
0x1219   : > { %vm1661_vm15 = vcmp.eq.s32.totalorder %v1660_v48, 1 }
0x127c   : > { %v1647_v45 = vpop.permute.xlu0 %1646 }
0x127d   : > { %v1649_v46 = vadd.f32 %v1647_v45, %v1639_v44 }
0x127f   : > { %2370 = vtanh.f32 %v1649_v46 }
0x1289   : > { %v2371_v47 = vpop.eup %2370 }
0x128a   : > { %1652 = vrot.lane.b32.xlu0 %v2371_v47, %s2392_s13 }
0x12fc   : > { %v1653_v49 = vpop.permute.xlu0 %1652 }
0x12fd   : > { %v1655_v50 = vmul.f32 %v2369_v40, %v1653_v49 }
0x12ff   : > { %v1662_v51 = vsel %vm1661_vm15, %v1655_v50, %v1554_v30 }
0x1300   : > { %1665 = vrot.lane.b32.xlu1 %v1662_v51, %s2393_s14 }
0x1372   : > { %v1666_v52 = vpop.permute.xlu1 %1665 }
0x1373   : > { %2178 = vmatmul.mubr.msk.f32.vlgmr.msra.gmra.mrb[6].mxu1 %vm311_vm1, %v1666_v52 }
0x1446   : > { %v1735_v53 = vpop.f32.mrb[6].mxu1 }
0x1447   : > { %v2283_v54 = vadd.f32 %v2528_v21, %v1735_v53  ;;  %v2179_v55 = vpop.f32.mrb[7].mxu1  ;;  %v1663_v21 = vsel %vm1661_vm15, %v1649_v46, %v1555_v43 }
0x1449   : > { %2372 = vtanh.f32 %v2283_v54  ;;  %v1918_v58 = vmul.f32 -1.442695, %v2283_v54 }
0x144b   : > { %2374 = vpow2.f32 %v1918_v58 }
0x1453   : > { %v2373_v56 = vpop.eup %2372 }
0x1454   : > { %1749 = vrot.lane.b32.xlu0 %v2373_v56, %s2392_s13 }
0x1455   : > { %v2375_v59 = vpop.eup %2374 }
0x1456   : > { %v1743_v60 = vadd.f32 1.0, %v2375_v59 }
0x1458   : > { %1767 = vperm.xlu0 %2315, %v1765_v57   ;;  %2376 = vrcp.f32 %v1743_v60 }
0x1462   : > { %v2377_v61 = vpop.eup %2376 }
0x1463   : > { %v1747_v19 = vmul.f32 %v2377_v61, %v1663_v21 }
0x14c6   : > { %v1750_v62 = vpop.permute.xlu0 %1749 }
0x14c7   : > { %v1752_v63 = vmul.f32 %v2377_v61, %v1750_v62 }
0x14c9   : > { %1754 = vrot.lane.b32.xlu1 %v1752_v63, %s2393_s14 }
0x14d7   : > { %v1768_v18 = vpop.permute.xlu0 %1767 }
0x14d8   : > { %vm1769_vm1 = vcmp.eq.s32.totalorder %v1768_v18, 1 }
0x153b   : > { %v1755_v2 = vpop.permute.xlu1 %1754 }
0x153c   : > { %v1757_v3 = vadd.f32 %v1755_v2, %v1747_v19 }
0x153e   : > { %2378 = vtanh.f32 %v1757_v3 }
0x1548   : > { %v2379_v4 = vpop.eup %2378 }
0x1549   : > { %1760 = vrot.lane.b32.xlu1 %v2379_v4, %s2392_s13 }
0x15bb   : > { %v1761_v5 = vpop.permute.xlu1 %1760 }
0x15bc   : > { %v1763_v6 = vmul.f32 %v2377_v61, %v1761_v5 }
0x15be   : > { %v1770_v7 = vsel %vm1769_vm1, %v1763_v6, %v1662_v51 }
0x15bf   : > { %1772 = vrot.lane.b32.xlu0 %v1770_v7, %s2393_s14 }
0x1631   : > { %v1773_v8 = vpop.permute.xlu0 %1772 }
0x1632   : > { %1776 = vst.msk [vmem:[%s293_s17] sm:$0x3] %vm1775_vm2, %v1773_v8 }
0x1633 PF: > { %s15_s18 = sadd.s32 1, %s2386_s18  }
0x1634   : > { %p12_p4 = scmp.ge.s32.totalorder %s15_s18, 4  }
0x1636   :  { %14 = sbr.rel (!%p12_p4) target bundleno = 1 (0x1), region = 89 }

</bundles_post_ra>
